<compile_context>
chip_gen: v7x
topology: tpu7x:2x2x1
jax: 0.10.0
libtpu: 0.0.40
codegen_flags: <defaults>
</compile_context>

<pallas_src>
import functools

import jax
import jax.numpy as jnp
from jax import lax
from jax.experimental import pallas as pl
from jax.experimental.pallas import tpu as pltpu


def _gatnet_kernel(x_ref, adj_ref,
                   w1_ref, asrc1_ref, adst1_ref, b1_ref,
                   w2_ref, asrc2_ref, adst2_ref, b2_ref,
                   out_ref, *, heads, c1):
    """Fused 2-layer GAT forward for one small graph.

    x_ref     : [N, Fin]        node features
    adj_ref   : [N, N]          adj_t[i, j] = 1 iff edge j -> i (with self loops)
    w1_ref    : [Fin, H*C1]     layer-1 weights, heads concatenated on lanes
    asrc1_ref : [H, H*C1]       block-diagonal att_src (row h nonzero on head-h cols)
    adst1_ref : [1, H*C1]       att_dst, heads concatenated
    b1_ref    : [1, H*C1]       layer-1 bias (post-concat)
    w2_ref    : [H*C1, C2]      layer-2 weights (single head)
    asrc2_ref : [1, C2]         layer-2 att_src
    adst2_ref : [1, C2]         layer-2 att_dst
    b2_ref    : [1, C2]         layer-2 bias
    out_ref   : [N, C2]         log-probabilities
    """
    x = x_ref[...]                      # [N, Fin]
    adj = adj_ref[...]                  # [N, N]
    neg_inf = jnp.float32(-1e30)

    def attend(xw_h, alpha_src_row, alpha_dst_col):
        # xw_h [N, C], alpha_src_row [1, N], alpha_dst_col [N, 1]
        e = alpha_dst_col + alpha_src_row                  # [N, N]
        e = jnp.where(e > 0, e, 0.2 * e)                   # LeakyReLU(0.2)
        # Mask to existing edges. Safe only because self-loops guarantee at
        # least one unmasked entry per row (otherwise 0/0 below).
        e = jnp.where(adj > 0, e, neg_inf)
        m = jnp.max(e, axis=1, keepdims=True)
        p = jnp.exp(e - m)
        s = jnp.sum(p, axis=1, keepdims=True)
        attn = p * pl.reciprocal(s, approx=True)           # EUP vrcp, ~free
        # TODO(synk): attention-coefficient dropout (p=0.6) only in training.
        return jnp.dot(attn, xw_h, preferred_element_type=jnp.float32)  # [N, C]

    # ---------------- conv1 (all heads in one MXU matmul) ----------------
    xw1 = jnp.dot(x, w1_ref[...], preferred_element_type=jnp.float32)   # [N, H*C1]
    # alpha_src for all heads at once, already in row form [H, N].
    asrc_rows = lax.dot_general(asrc1_ref[...], xw1,
                                (((1,), (1,)), ((), ())),
                                preferred_element_type=jnp.float32)     # [H, N]
    head_outs = []
    for h in range(heads):                                  # unrolled (H=2)
        xw_h = xw1[:, h * c1:(h + 1) * c1]                  # [N, C1]
        a_dst_h = adst1_ref[:, h * c1:(h + 1) * c1]         # [1, C1]
        alpha_dst = jnp.sum(xw_h * a_dst_h, axis=-1, keepdims=True)   # [N, 1]
        head_outs.append(attend(xw_h, asrc_rows[h:h + 1, :], alpha_dst))
    h1 = jnp.concatenate(head_outs, axis=1) + b1_ref[...]   # [N, H*C1]
    # F.elu: exp only ever sees <= 0 inputs -> no inf in the discarded branch.
    h1 = jnp.where(h1 > 0, h1, jnp.exp(jnp.minimum(h1, 0.0)) - 1.0)
    # TODO(synk): inter-layer dropout (p=0.6) only active in training.

    # ---------------- conv2 (single head) ----------------
    xw2 = jnp.dot(h1, w2_ref[...], preferred_element_type=jnp.float32)  # [N, C2]
    asrc_row2 = lax.dot_general(asrc2_ref[...], xw2,
                                (((1,), (1,)), ((), ())),
                                preferred_element_type=jnp.float32)     # [1, N]
    alpha_dst2 = jnp.sum(xw2 * adst2_ref[...], axis=-1, keepdims=True)  # [N, 1]
    h2 = attend(xw2, asrc_row2, alpha_dst2) + b2_ref[...]               # [N, C2]

    # ---------------- log_softmax over classes ----------------
    m2 = jnp.max(h2, axis=1, keepdims=True)
    z = h2 - m2
    lse = jnp.log(jnp.sum(jnp.exp(z), axis=1, keepdims=True))
    out_ref[...] = z - lse


def init_params(key, num_features, hidden_dim, num_classes, heads):
    """Deterministic synthetic parameters (glorot-ish scale)."""
    ks = jax.random.split(key, 8)

    def glorot(k, shape, fan_in, fan_out):
        scale = jnp.sqrt(6.0 / (fan_in + fan_out))
        return jax.random.uniform(k, shape, jnp.float32, -scale, scale)

    return {
        # conv1: GATConv(num_features, hidden_dim, heads=2) -> out 2*hidden
        "w1": glorot(ks[0], (heads, num_features, hidden_dim),
                     num_features, hidden_dim),
        "a_src1": glorot(ks[1], (heads, 1, hidden_dim), hidden_dim, 1),
        "a_dst1": glorot(ks[2], (heads, 1, hidden_dim), hidden_dim, 1),
        "b1": jnp.zeros((heads, 1, hidden_dim), jnp.float32),
        # conv2: GATConv(2*hidden_dim, num_classes, heads=1)
        "w2": glorot(ks[3], (1, heads * hidden_dim, num_classes),
                     heads * hidden_dim, num_classes),
        "a_src2": glorot(ks[4], (1, 1, num_classes), num_classes, 1),
        "a_dst2": glorot(ks[5], (1, 1, num_classes), num_classes, 1),
        "b2": jnp.zeros((1, 1, num_classes), jnp.float32),
    }


def gatnet_forward(params, x, adj_t):
    """Full GATNet forward (eval mode): conv1 -> ELU -> conv2 -> log_softmax."""
    N, f_in = x.shape
    H, _, c1 = params["w1"].shape
    c2 = params["w2"].shape[-1]

    # Host-side parameter packing (lane-concat heads; block-diag att_src).
    w1_cat = jnp.transpose(params["w1"], (1, 0, 2)).reshape(f_in, H * c1)
    a_dst1_cat = jnp.transpose(params["a_dst1"], (1, 0, 2)).reshape(1, H * c1)
    b1_cat = jnp.transpose(params["b1"], (1, 0, 2)).reshape(1, H * c1)
    a_src1 = params["a_src1"][:, 0, :]                       # [H, C1]
    a_src1_blk = jnp.zeros((H, H * c1), jnp.float32)
    for h in range(H):
        a_src1_blk = a_src1_blk.at[h, h * c1:(h + 1) * c1].set(a_src1[h])

    w2 = params["w2"][0]                                     # [H*C1, C2]
    a_src2 = params["a_src2"][0]                             # [1, C2]
    a_dst2 = params["a_dst2"][0]                             # [1, C2]
    b2 = params["b2"][0]                                     # [1, C2]

    kernel = functools.partial(_gatnet_kernel, heads=H, c1=c1)
    # Single invocation, no grid: every operand fits comfortably in VMEM,
    # so default (full-array) BlockSpecs are used.
    return pl.pallas_call(
        kernel,
        out_shape=jax.ShapeDtypeStruct((N, c2), jnp.float32),
    )(x, adj_t, w1_cat, a_src1_blk, a_dst1_cat, b1_cat,
      w2, a_src2, a_dst2, b2)


if __name__ == "__main__":
    N = 64            # nodes
    NUM_FEATURES = 32
    HIDDEN = 8
    HEADS = 2
    NUM_CLASSES = 16

    key = jax.random.PRNGKey(0)
    k_x, k_adj, k_p = jax.random.split(key, 3)

    x = jax.random.normal(k_x, (N, NUM_FEATURES), jnp.float32)
    # Dense transposed adjacency (edge j->i), plus self-loops.
    adj = jax.random.bernoulli(k_adj, 0.1, (N, N)).astype(jnp.float32)
    adj_t = jnp.maximum(adj, jnp.eye(N, dtype=jnp.float32))

    params = init_params(k_p, NUM_FEATURES, HIDDEN, NUM_CLASSES, HEADS)

    out = gatnet_forward(params, x, adj_t)
    out = jax.block_until_ready(out)
    assert out.shape == (N, NUM_CLASSES)
    print("KERNEL_OK")
</pallas_src>

<mosaic_0001>
module attributes {stable_mosaic.version = 11 : i64} {
  func.func @_gatnet_kernel(%arg0: memref<64x32xf32, #tpu.memory_space<vmem>>, %arg1: memref<64x64xf32, #tpu.memory_space<vmem>>, %arg2: memref<32x16xf32, #tpu.memory_space<vmem>>, %arg3: memref<2x16xf32, #tpu.memory_space<vmem>>, %arg4: memref<1x16xf32, #tpu.memory_space<vmem>>, %arg5: memref<1x16xf32, #tpu.memory_space<vmem>>, %arg6: memref<16x16xf32, #tpu.memory_space<vmem>>, %arg7: memref<1x16xf32, #tpu.memory_space<vmem>>, %arg8: memref<1x16xf32, #tpu.memory_space<vmem>>, %arg9: memref<1x16xf32, #tpu.memory_space<vmem>>, %arg10: memref<64x16xf32, #tpu.memory_space<vmem>>) attributes {dimension_semantics = [], scalar_prefetch = 0 : i64, scratch_operands = 0 : i64, tpu.core_type = #tpu.core_type<tc>} {
    %c0 = arith.constant 0 : index
    %c0_0 = arith.constant 0 : index
    %0 = vector.load %arg0[%c0, %c0_0] : memref<64x32xf32, #tpu.memory_space<vmem>>, vector<64x32xf32>
    %c0_1 = arith.constant 0 : index
    %c0_2 = arith.constant 0 : index
    %1 = vector.load %arg1[%c0_1, %c0_2] : memref<64x64xf32, #tpu.memory_space<vmem>>, vector<64x64xf32>
    %c0_3 = arith.constant 0 : index
    %c0_4 = arith.constant 0 : index
    %2 = vector.load %arg2[%c0_3, %c0_4] : memref<32x16xf32, #tpu.memory_space<vmem>>, vector<32x16xf32>
    %cst = arith.constant dense<0.000000e+00> : vector<64x16xf32>
    %3 = tpu.matmul %0, %2, %cst {dimension_numbers = #tpu.dot_dimension_numbers<[1], [0], [0], [1], [0, 0, 1, 1], [], []>} : vector<64x32xf32>, vector<32x16xf32>, vector<64x16xf32> -> vector<64x16xf32>
    %c0_5 = arith.constant 0 : index
    %c0_6 = arith.constant 0 : index
    %4 = vector.load %arg3[%c0_5, %c0_6] : memref<2x16xf32, #tpu.memory_space<vmem>>, vector<2x16xf32>
    %cst_7 = arith.constant dense<0.000000e+00> : vector<2x64xf32>
    %5 = tpu.matmul %4, %3, %cst_7 {dimension_numbers = #tpu.dot_dimension_numbers<[1], [1], [0], [0], [0, 0, 1, 0], [], []>} : vector<2x16xf32>, vector<64x16xf32>, vector<2x64xf32> -> vector<2x64xf32>
    %6 = vector.extract_strided_slice %3 {offsets = [0, 0], sizes = [64, 8], strides = [1, 1]} : vector<64x16xf32> to vector<64x8xf32>
    %c0_8 = arith.constant 0 : index
    %c0_9 = arith.constant 0 : index
    %7 = vector.load %arg4[%c0_8, %c0_9] : memref<1x16xf32, #tpu.memory_space<vmem>>, vector<1x8xf32>
    %8 = vector.broadcast %7 : vector<1x8xf32> to vector<64x8xf32>
    %9 = arith.mulf %6, %8 : vector<64x8xf32>
    %cst_10 = arith.constant dense<0.000000e+00> : vector<64xf32>
    %10 = vector.multi_reduction <add>, %9, %cst_10 [1] : vector<64x8xf32> to vector<64xf32>
    %11 = vector.shape_cast %10 : vector<64xf32> to vector<64x1xf32>
    %12 = vector.extract_strided_slice %5 {offsets = [0, 0], sizes = [1, 64], strides = [1, 1]} : vector<2x64xf32> to vector<1x64xf32>
    %13 = vector.broadcast %11 : vector<64x1xf32> to vector<64x64xf32>
    %14 = vector.broadcast %12 : vector<1x64xf32> to vector<64x64xf32>
    %15 = arith.addf %13, %14 : vector<64x64xf32>
    %cst_11 = arith.constant 0.000000e+00 : f32
    %16 = vector.broadcast %cst_11 : f32 to vector<64x64xf32>
    %17 = arith.cmpf ogt, %15, %16 : vector<64x64xf32>
    %cst_12 = arith.constant 2.000000e-01 : f32
    %18 = vector.broadcast %cst_12 : f32 to vector<64x64xf32>
    %19 = arith.mulf %18, %15 : vector<64x64xf32>
    %20 = arith.select %17, %15, %19 : vector<64x64xi1>, vector<64x64xf32>
    %cst_13 = arith.constant 0.000000e+00 : f32
    %21 = vector.broadcast %cst_13 : f32 to vector<64x64xf32>
    %22 = arith.cmpf ogt, %1, %21 : vector<64x64xf32>
    %cst_14 = arith.constant -1.000000e+30 : f32
    %23 = vector.broadcast %cst_14 : f32 to vector<64x64xf32>
    %24 = arith.select %22, %20, %23 : vector<64x64xi1>, vector<64x64xf32>
    %cst_15 = arith.constant dense<0xFF800000> : vector<64xf32>
    %25 = vector.multi_reduction <maximumf>, %24, %cst_15 [1] : vector<64x64xf32> to vector<64xf32>
    %26 = vector.shape_cast %25 : vector<64xf32> to vector<64x1xf32>
    %27 = vector.broadcast %26 : vector<64x1xf32> to vector<64x64xf32>
    %28 = arith.subf %24, %27 : vector<64x64xf32>
    %29 = math.exp %28 : vector<64x64xf32>
    %cst_16 = arith.constant dense<0.000000e+00> : vector<64xf32>
    %30 = vector.multi_reduction <add>, %29, %cst_16 [1] : vector<64x64xf32> to vector<64xf32>
    %31 = vector.shape_cast %30 : vector<64xf32> to vector<64x1xf32>
    %32 = tpu.reciprocal %31 {approx = true} : vector<64x1xf32> -> vector<64x1xf32>
    %33 = vector.broadcast %32 : vector<64x1xf32> to vector<64x64xf32>
    %34 = arith.mulf %29, %33 : vector<64x64xf32>
    %cst_17 = arith.constant dense<0.000000e+00> : vector<64x8xf32>
    %35 = tpu.matmul %34, %6, %cst_17 {dimension_numbers = #tpu.dot_dimension_numbers<[1], [0], [0], [1], [0, 0, 1, 1], [], []>} : vector<64x64xf32>, vector<64x8xf32>, vector<64x8xf32> -> vector<64x8xf32>
    %36 = vector.extract_strided_slice %3 {offsets = [0, 8], sizes = [64, 8], strides = [1, 1]} : vector<64x16xf32> to vector<64x8xf32>
    %c0_18 = arith.constant 0 : index
    %c8 = arith.constant 8 : index
    %37 = vector.load %arg4[%c0_18, %c8] : memref<1x16xf32, #tpu.memory_space<vmem>>, vector<1x8xf32>
    %38 = vector.broadcast %37 : vector<1x8xf32> to vector<64x8xf32>
    %39 = arith.mulf %36, %38 : vector<64x8xf32>
    %cst_19 = arith.constant dense<0.000000e+00> : vector<64xf32>
    %40 = vector.multi_reduction <add>, %39, %cst_19 [1] : vector<64x8xf32> to vector<64xf32>
    %41 = vector.shape_cast %40 : vector<64xf32> to vector<64x1xf32>
    %42 = vector.extract_strided_slice %5 {offsets = [1, 0], sizes = [1, 64], strides = [1, 1]} : vector<2x64xf32> to vector<1x64xf32>
    %43 = vector.broadcast %41 : vector<64x1xf32> to vector<64x64xf32>
    %44 = vector.broadcast %42 : vector<1x64xf32> to vector<64x64xf32>
    %45 = arith.addf %43, %44 : vector<64x64xf32>
    %cst_20 = arith.constant 0.000000e+00 : f32
    %46 = vector.broadcast %cst_20 : f32 to vector<64x64xf32>
    %47 = arith.cmpf ogt, %45, %46 : vector<64x64xf32>
    %cst_21 = arith.constant 2.000000e-01 : f32
    %48 = vector.broadcast %cst_21 : f32 to vector<64x64xf32>
    %49 = arith.mulf %48, %45 : vector<64x64xf32>
    %50 = arith.select %47, %45, %49 : vector<64x64xi1>, vector<64x64xf32>
    %cst_22 = arith.constant 0.000000e+00 : f32
    %51 = vector.broadcast %cst_22 : f32 to vector<64x64xf32>
    %52 = arith.cmpf ogt, %1, %51 : vector<64x64xf32>
    %cst_23 = arith.constant -1.000000e+30 : f32
    %53 = vector.broadcast %cst_23 : f32 to vector<64x64xf32>
    %54 = arith.select %52, %50, %53 : vector<64x64xi1>, vector<64x64xf32>
    %cst_24 = arith.constant dense<0xFF800000> : vector<64xf32>
    %55 = vector.multi_reduction <maximumf>, %54, %cst_24 [1] : vector<64x64xf32> to vector<64xf32>
    %56 = vector.shape_cast %55 : vector<64xf32> to vector<64x1xf32>
    %57 = vector.broadcast %56 : vector<64x1xf32> to vector<64x64xf32>
    %58 = arith.subf %54, %57 : vector<64x64xf32>
    %59 = math.exp %58 : vector<64x64xf32>
    %cst_25 = arith.constant dense<0.000000e+00> : vector<64xf32>
    %60 = vector.multi_reduction <add>, %59, %cst_25 [1] : vector<64x64xf32> to vector<64xf32>
    %61 = vector.shape_cast %60 : vector<64xf32> to vector<64x1xf32>
    %62 = tpu.reciprocal %61 {approx = true} : vector<64x1xf32> -> vector<64x1xf32>
    %63 = vector.broadcast %62 : vector<64x1xf32> to vector<64x64xf32>
    %64 = arith.mulf %59, %63 : vector<64x64xf32>
    %cst_26 = arith.constant dense<0.000000e+00> : vector<64x8xf32>
    %65 = tpu.matmul %64, %36, %cst_26 {dimension_numbers = #tpu.dot_dimension_numbers<[1], [0], [0], [1], [0, 0, 1, 1], [], []>} : vector<64x64xf32>, vector<64x8xf32>, vector<64x8xf32> -> vector<64x8xf32>
    %66 = tpu.concatenate %35, %65 in 1 : vector<64x8xf32>, vector<64x8xf32> -> vector<64x16xf32>
    %c0_27 = arith.constant 0 : index
    %c0_28 = arith.constant 0 : index
    %67 = vector.load %arg5[%c0_27, %c0_28] : memref<1x16xf32, #tpu.memory_space<vmem>>, vector<1x16xf32>
    %68 = vector.broadcast %67 : vector<1x16xf32> to vector<64x16xf32>
    %69 = arith.addf %66, %68 : vector<64x16xf32>
    %cst_29 = arith.constant 0.000000e+00 : f32
    %70 = vector.broadcast %cst_29 : f32 to vector<64x16xf32>
    %71 = arith.cmpf ogt, %69, %70 : vector<64x16xf32>
    %cst_30 = arith.constant 0.000000e+00 : f32
    %72 = vector.broadcast %cst_30 : f32 to vector<64x16xf32>
    %73 = arith.minimumf %69, %72 : vector<64x16xf32>
    %74 = math.exp %73 : vector<64x16xf32>
    %cst_31 = arith.constant 1.000000e+00 : f32
    %75 = vector.broadcast %cst_31 : f32 to vector<64x16xf32>
    %76 = arith.subf %74, %75 : vector<64x16xf32>
    %77 = arith.select %71, %69, %76 : vector<64x16xi1>, vector<64x16xf32>
    %c0_32 = arith.constant 0 : index
    %c0_33 = arith.constant 0 : index
    %78 = vector.load %arg6[%c0_32, %c0_33] : memref<16x16xf32, #tpu.memory_space<vmem>>, vector<16x16xf32>
    %cst_34 = arith.constant dense<0.000000e+00> : vector<64x16xf32>
    %79 = tpu.matmul %77, %78, %cst_34 {dimension_numbers = #tpu.dot_dimension_numbers<[1], [0], [0], [1], [0, 0, 1, 1], [], []>} : vector<64x16xf32>, vector<16x16xf32>, vector<64x16xf32> -> vector<64x16xf32>
    %c0_35 = arith.constant 0 : index
    %c0_36 = arith.constant 0 : index
    %80 = vector.load %arg7[%c0_35, %c0_36] : memref<1x16xf32, #tpu.memory_space<vmem>>, vector<1x16xf32>
    %cst_37 = arith.constant dense<0.000000e+00> : vector<1x64xf32>
    %81 = tpu.matmul %80, %79, %cst_37 {dimension_numbers = #tpu.dot_dimension_numbers<[1], [1], [0], [0], [0, 0, 1, 0], [], []>} : vector<1x16xf32>, vector<64x16xf32>, vector<1x64xf32> -> vector<1x64xf32>
    %c0_38 = arith.constant 0 : index
    %c0_39 = arith.constant 0 : index
    %82 = vector.load %arg8[%c0_38, %c0_39] : memref<1x16xf32, #tpu.memory_space<vmem>>, vector<1x16xf32>
    %83 = vector.broadcast %82 : vector<1x16xf32> to vector<64x16xf32>
    %84 = arith.mulf %79, %83 : vector<64x16xf32>
    %cst_40 = arith.constant dense<0.000000e+00> : vector<64xf32>
    %85 = vector.multi_reduction <add>, %84, %cst_40 [1] : vector<64x16xf32> to vector<64xf32>
    %86 = vector.shape_cast %85 : vector<64xf32> to vector<64x1xf32>
    %87 = vector.broadcast %86 : vector<64x1xf32> to vector<64x64xf32>
    %88 = vector.broadcast %81 : vector<1x64xf32> to vector<64x64xf32>
    %89 = arith.addf %87, %88 : vector<64x64xf32>
    %cst_41 = arith.constant 0.000000e+00 : f32
    %90 = vector.broadcast %cst_41 : f32 to vector<64x64xf32>
    %91 = arith.cmpf ogt, %89, %90 : vector<64x64xf32>
    %cst_42 = arith.constant 2.000000e-01 : f32
    %92 = vector.broadcast %cst_42 : f32 to vector<64x64xf32>
    %93 = arith.mulf %92, %89 : vector<64x64xf32>
    %94 = arith.select %91, %89, %93 : vector<64x64xi1>, vector<64x64xf32>
    %cst_43 = arith.constant 0.000000e+00 : f32
    %95 = vector.broadcast %cst_43 : f32 to vector<64x64xf32>
    %96 = arith.cmpf ogt, %1, %95 : vector<64x64xf32>
    %cst_44 = arith.constant -1.000000e+30 : f32
    %97 = vector.broadcast %cst_44 : f32 to vector<64x64xf32>
    %98 = arith.select %96, %94, %97 : vector<64x64xi1>, vector<64x64xf32>
    %cst_45 = arith.constant dense<0xFF800000> : vector<64xf32>
    %99 = vector.multi_reduction <maximumf>, %98, %cst_45 [1] : vector<64x64xf32> to vector<64xf32>
    %100 = vector.shape_cast %99 : vector<64xf32> to vector<64x1xf32>
    %101 = vector.broadcast %100 : vector<64x1xf32> to vector<64x64xf32>
    %102 = arith.subf %98, %101 : vector<64x64xf32>
    %103 = math.exp %102 : vector<64x64xf32>
    %cst_46 = arith.constant dense<0.000000e+00> : vector<64xf32>
    %104 = vector.multi_reduction <add>, %103, %cst_46 [1] : vector<64x64xf32> to vector<64xf32>
    %105 = vector.shape_cast %104 : vector<64xf32> to vector<64x1xf32>
    %106 = tpu.reciprocal %105 {approx = true} : vector<64x1xf32> -> vector<64x1xf32>
    %107 = vector.broadcast %106 : vector<64x1xf32> to vector<64x64xf32>
    %108 = arith.mulf %103, %107 : vector<64x64xf32>
    %cst_47 = arith.constant dense<0.000000e+00> : vector<64x16xf32>
    %109 = tpu.matmul %108, %79, %cst_47 {dimension_numbers = #tpu.dot_dimension_numbers<[1], [0], [0], [1], [0, 0, 1, 1], [], []>} : vector<64x64xf32>, vector<64x16xf32>, vector<64x16xf32> -> vector<64x16xf32>
    %c0_48 = arith.constant 0 : index
    %c0_49 = arith.constant 0 : index
    %110 = vector.load %arg9[%c0_48, %c0_49] : memref<1x16xf32, #tpu.memory_space<vmem>>, vector<1x16xf32>
    %111 = vector.broadcast %110 : vector<1x16xf32> to vector<64x16xf32>
    %112 = arith.addf %109, %111 : vector<64x16xf32>
    %cst_50 = arith.constant dense<0xFF800000> : vector<64xf32>
    %113 = vector.multi_reduction <maximumf>, %112, %cst_50 [1] : vector<64x16xf32> to vector<64xf32>
    %114 = vector.shape_cast %113 : vector<64xf32> to vector<64x1xf32>
    %115 = vector.broadcast %114 : vector<64x1xf32> to vector<64x16xf32>
    %116 = arith.subf %112, %115 : vector<64x16xf32>
    %117 = math.exp %116 : vector<64x16xf32>
    %cst_51 = arith.constant dense<0.000000e+00> : vector<64xf32>
    %118 = vector.multi_reduction <add>, %117, %cst_51 [1] : vector<64x16xf32> to vector<64xf32>
    %119 = vector.shape_cast %118 : vector<64xf32> to vector<64x1xf32>
    %120 = math.log %119 : vector<64x1xf32>
    %121 = vector.broadcast %120 : vector<64x1xf32> to vector<64x16xf32>
    %122 = arith.subf %116, %121 : vector<64x16xf32>
    %c0_52 = arith.constant 0 : index
    %c0_53 = arith.constant 0 : index
    %123 = vector.load %arg10[%c0_52, %c0_53] : memref<64x16xf32, #tpu.memory_space<vmem>>, vector<64x16xf32>
    tpu.vector_store %arg10[%c0_52, %c0_53], %122 {strides = array<i32>} : memref<64x16xf32, #tpu.memory_space<vmem>>, vector<64x16xf32>,
    return
  }
}

</mosaic_0001>

<bundles_post_ra>
// kernel: tpu_custom_call.1
= control target key start
LH: loop header
LB: loop body
LE: loop exit
PB: predicated region body
PF: predicated region fallthrough
CT: control target
= control target key end

     0   :  { %vm55_vm0 = vcmask 261120   ;;  %v2259_v14 = vmov 0.0|0.0   ;;  %vm2260_vm1 = vmmov 0   ;;  %v2261_v15 = vmov 0.0   ;;  %s2938_s2 = inlined_call_operand.vmem [shape: f32[32,16], index: 2, kind: input, shape index: {}]   ;;  %s2939_s0 = inlined_call_operand.vmem [shape: f32[64,32], index: 0, kind: input, shape index: {}]   ;;  %s2940_s4 = inlined_call_operand.vmem [shape: f32[1,16], index: 4, kind: input, shape index: {}]   ;;  %s2941_s3 = inlined_call_operand.vmem [shape: f32[2,16], index: 3, kind: input, shape index: {}]   ;;  %s2942_s1 = inlined_call_operand.vmem [shape: f32[64,64], index: 1, kind: input, shape index: {}]   ;;  %s2943_s6 = inlined_call_operand.vmem [shape: f32[16,16], index: 6, kind: input, shape index: {}]   ;;  %s2944_s5 = inlined_call_operand.vmem [shape: f32[1,16], index: 5, kind: input, shape index: {}]   ;;  %s2945_s8 = inlined_call_operand.vmem [shape: f32[1,16], index: 8, kind: input, shape index: {}]   ;;  %s2946_s7 = inlined_call_operand.vmem [shape: f32[1,16], index: 7, kind: input, shape index: {}]   ;;  %s2947_s9 = inlined_call_operand.vmem [shape: f32[1,16], index: 9, kind: input, shape index: {}]   ;;  %s2948_s10 = inlined_call_operand.vmem [shape: f32[64,16], index: 10, kind: output, shape index: {}]  }
   0x1   :  { %v51_v0 = vld [vmem:[%s2938_s2] sm:$0xff]  ;;  %v52_v1 = vld [vmem:[%s2938_s2 + $0x8] sm:$0xff]  ;;  %v53_v2 = vld [vmem:[%s2938_s2 + $0x10] sm:$0xff]  ;;  %2006 = vmatprep.subr.bf16.mxu1 %v2259_v14  ;;  %1876 = vmatprep.mubr.msk.f32.mxu1 %vm2260_vm1, %v2261_v15  ;;  %vm186_vm2 = vcmask 130048   ;;  %vm299_vm4 = vcmask 64512   ;;  %vm376_vm6 = vcmask 523264  }
   0x2   :  { %v1998_v3 = vpack.c.bf16 %v52_v1, %v51_v0  ;;  %v54_v4 = vld [vmem:[%s2938_s2 + $0x18] sm:$0xff]  ;;  %v35_v5 = vld [vmem:[%s2939_s0] sm:$0xff]  ;;  %v36_v7 = vld [vmem:[%s2939_s0 + $0x8] sm:$0xff] }
   0x3   :  { %v2002_v6 = vpack.c.bf16 %v54_v4, %v53_v2  ;;  %1848 = vmatprep.mubr.msk.f32.mxu0 %vm55_vm0, %v35_v5  ;;  %v37_v8 = vld [vmem:[%s2939_s0 + $0x10] sm:$0xff]  ;;  %v38_v9 = vld [vmem:[%s2939_s0 + $0x18] sm:$0xff]  ;;  %v39_v10 = vld [vmem:[%s2939_s0 + $0x20] sm:$0xff]  ;;  %v324_v4 = vlaneseq }
   0x4   :  { %1999 = vmatprep.subr.bf16.mxu0 %v1998_v3  ;;  %v40_v11 = vld [vmem:[%s2939_s0 + $0x28] sm:$0xff]  ;;  %v41_v12 = vld [vmem:[%s2939_s0 + $0x30] sm:$0xff]  ;;  %v42_v13 = vld [vmem:[%s2939_s0 + $0x38] sm:$0xff]  ;;  %s2262_s0 = smov 120  }
   0x5   :  { %2001 = vmatpush3.bf16.msra.mxu0 %v1998_v3  ;;  %v1699_v16 = vld [vmem:[%s2940_s4] ss:$0 sm:$0xff]  ;;  %vm2376_vm3 = vmpackc.low %vm186_vm2, %vm186_vm2 }
   0x6   :  { %2003 = vmatprep.subr.bf16.mxu0 %v2002_v6  ;;  %v185_v41 = vld [vmem:[%s2941_s3] sm:$0x3] }
   0x9   :  { %2005 = vmatpush3.bf16.msra.mxu0 %v2002_v6 }
   0xc   :  { %1849 = vmatmul.mubr.msk.f32.vlgmr.msra.gmra.mrb[0].mxu0 %vm55_vm0, %v36_v7  ;;  %v2454_v7 = vshrl.u32 %v324_v4, 7 }
   0xd   :  { %1851 = vmatprep.mubr.msk.f32.mxu0 %vm55_vm0, %v37_v8 }
  0x10   :  { %1852 = vmatmul.mubr.msk.f32.gmra.mrb[2].mxu0 %vm55_vm0, %v38_v9  ;;  %v326_v9 = vsub.s32 0, %v2454_v7 }
  0x11   :  { %1854 = vmatprep.mubr.msk.f32.mxu0 %vm55_vm0, %v39_v10 }
  0x14   :  { %1855 = vmatmul.mubr.msk.f32.gmra.mrb[4].mxu0 %vm55_vm0, %v40_v11  ;;  %v2460_v11 = vld [vmem:[%s2942_s1 + $0x8] sm:$0xff] }
  0x15   :  { %1857 = vmatprep.mubr.msk.f32.mxu0 %vm55_vm0, %v41_v12  ;;  %v2465_v12 = vld [vmem:[%s2942_s1] sm:$0xff]  ;;  %vm361_vm5 = vcmp.gt.f32.partialorder %v2460_v11, 0.0 }
  0x16   :  { %vm360_vm7 = vcmp.gt.f32.partialorder %v2465_v12, 0.0 }
  0x18   :  { %1858 = vmatmul.mubr.msk.f32.gmra.mrb[6].mxu0 %vm55_vm0, %v42_v13 }
  0xdf   :  { %v2369_v17 = vpop.f32.mrb[0].mxu0 }
  0xe0   :  { %v2371_v18 = vpop.f32.mrb[1].mxu0  ;;  %v292_v19 = vmul.f32 %v2369_v17, %v1699_v16 }
  0xe1   :  { %v2095_v21 = vpack.i.bf16 %v2369_v17, %v2371_v18  ;;  %v2007_v22 = vpack.c.bf16 %v2369_v17, %v2371_v18  ;;  %v291_v24 = vmul.f32 %v1699_v16, %v2371_v18 }
  0xe2   :  { %604 = vrot.lane.b32.xlu0 %v292_v19, %s2262_s0  ;;  %v303_v43 = vsel %vm299_vm4, %v292_v19, 0.0 }
  0xe3   :  { %v2385_v23 = vpop.f32.mrb[2].mxu0  ;;  %2009 = vmatpush3.bf16.xpose.msk.msra.mxu1 %vm2376_vm3, %v2007_v22  ;;  %2023 = vmatprep.subr.bf16.mxu0 %v2007_v22  ;;  %v300_v42 = vsel %vm299_vm4, %v291_v24, 0.0 }
  0xe4   :  { %v2390_v25 = vpop.f32.mrb[3].mxu0  ;;  %2025 = vmatpush3.bf16.msra.mxu0 %v2007_v22  ;;  %2010 = vmatprep.subr.bf16.mxu1 %v2259_v14  ;;  %v294_v31 = vmul.f32 %v2385_v23, %v1699_v16 }
  0xe5   :  { %v2100_v26 = vpack.i.bf16 %v2385_v23, %v2390_v25  ;;  %v2011_v27 = vpack.c.bf16 %v2385_v23, %v2390_v25  ;;  %v293_v28 = vmul.f32 %v1699_v16, %v2390_v25 }
  0xe6   :  { %602 = vrot.lane.b32.xlu0 %v291_v24, %s2262_s0  ;;  %v309_v48 = vsel %vm299_vm4, %v294_v31, 0.0  ;;  %v2472_v24 = vld [vmem:[%s2942_s1 + $0x18] sm:$0xff] }
  0xe7   :  { %606 = vrot.lane.b32.xlu1 %v293_v28, %s2262_s0  ;;  %v2400_v29 = vpop.f32.mrb[4].mxu0  ;;  %2027 = vmatprep.subr.bf16.mxu0 %v2011_v27  ;;  %v306_v47 = vsel %vm299_vm4, %v293_v28, 0.0  ;;  %vm363_vm8 = vcmp.gt.f32.partialorder %v2472_v24, 0.0 }
  0xe8   :  { %v2402_v30 = vpop.f32.mrb[5].mxu0  ;;  %2029 = vmatpush3.bf16.msra.mxu0 %v2011_v27  ;;  %v296_v37 = vmul.f32 %v2400_v29, %v1699_v16 }
  0xe9   :  { %v2105_v32 = vpack.i.bf16 %v2400_v29, %v2402_v30  ;;  %v2015_v33 = vpack.c.bf16 %v2400_v29, %v2402_v30  ;;  %v295_v34 = vmul.f32 %v1699_v16, %v2402_v30 }
  0xea   :  { %v315_v49 = vsel %vm299_vm4, %v296_v37, 0.0 }
  0xeb   :  { %608 = vrot.lane.b32.xlu1 %v294_v31, %s2262_s0  ;;  %2013 = vmatpush3.bf16.xpose.msk.msra.mxu1 %vm2376_vm3, %v2011_v27  ;;  %v2413_v35 = vpop.f32.mrb[6].mxu0  ;;  %v312_v44 = vsel %vm299_vm4, %v295_v34, 0.0  ;;  %v2477_v27 = vld [vmem:[%s2942_s1 + $0x10] sm:$0xff] }
  0xec   :  { %610 = vrot.lane.b32.xlu0 %v295_v34, %s2262_s0  ;;  %2031 = vmatprep.subr.bf16.mxu0 %v2015_v33  ;;  %v2416_v36 = vpop.f32.mrb[7].mxu0  ;;  %v298_v40 = vmul.f32 %v2413_v35, %v1699_v16  ;;  %vm362_vm9 = vcmp.gt.f32.partialorder %v2477_v27, 0.0 }
  0xed   :  { %2033 = vmatpush3.bf16.msra.mxu0 %v2015_v33  ;;  %2014 = vmatprep.subr.bf16.mxu1 %v2259_v14  ;;  %v2110_v38 = vpack.i.bf16 %v2413_v35, %v2416_v36  ;;  %v2019_v39 = vpack.c.bf16 %v2413_v35, %v2416_v36  ;;  %v297_v45 = vmul.f32 %v1699_v16, %v2416_v36 }
  0xee   :  { %v321_v50 = vsel %vm299_vm4, %v298_v40, 0.0 }
  0xef   :  { %612 = vrot.lane.b32.xlu1 %v296_v37, %s2262_s0  ;;  %2035 = vmatprep.subr.bf16.mxu0 %v2019_v39  ;;  %v318_v46 = vsel %vm299_vm4, %v297_v45, 0.0 }
  0xf1   :  { %2037 = vmatpush3.bf16.msra.mxu0 %v2019_v39 }
  0xf3   :  { %2017 = vmatpush3.bf16.xpose.msk.msra.mxu1 %vm2376_vm3, %v2015_v33  ;;  %616 = vrot.lane.b32.xlu1 %v298_v40, %s2262_s0 }
  0xf4   :  { %2018 = vmatprep.subr.bf16.mxu1 %v2259_v14 }
  0xfb   :  { %2021 = vmatpush3.bf16.xpose.msk.msra.mxu1 %vm2376_vm3, %v2019_v39 }
 0x102   :  { %1877 = vmatmul.mubr.msk.f32.vlgmr.msra.gmra.mrb[0].mxu1 %vm186_vm2, %v185_v41 }
 0x10b   :  { %301 = vadd.xlane.f32.xlu0 %v300_v42 }
 0x117   :  { %304 = vadd.xlane.f32.xlu1 %v303_v43 }
 0x11b   :  { %313 = vadd.xlane.f32.xlu1 %v312_v44 }
 0x11f   :  { %319 = vadd.xlane.f32.xlu1 %v318_v46 }
 0x121   :  { %614 = vrot.lane.b32.xlu0 %v297_v45, %s2262_s0 }
 0x140   :  { %307 = vadd.xlane.f32.xlu0 %v306_v47 }
 0x144   :  { %310 = vadd.xlane.f32.xlu0 %v309_v48  ;;  %v2486_v48 = vld [vmem:[%s2942_s1 + $0x28] sm:$0xff] }
 0x145   :  { %vm365_vm15 = vcmp.gt.f32.partialorder %v2486_v48, 0.0 }
 0x148   :  { %316 = vadd.xlane.f32.xlu0 %v315_v49 }
 0x14c   :  { %322 = vadd.xlane.f32.xlu0 %v321_v50 }
 0x154   :  { %v605_v51 = vpop.permute.xlu0 %604 }
 0x155   :  { %v629_v52 = vsel %vm299_vm4, %v605_v51, 0.0 }
 0x156   :  { %630 = vadd.xlane.f32.xlu0 %v629_v52 }
 0x158   :  { %v603_v53 = vpop.permute.xlu0 %602 }
 0x159   :  { %v607_v54 = vpop.permute.xlu1 %606  ;;  %v626_v55 = vsel %vm299_vm4, %v603_v53, 0.0 }
 0x15a   :  { %627 = vadd.xlane.f32.xlu1 %v626_v55  ;;  %v632_v57 = vsel %vm299_vm4, %v607_v54, 0.0  ;;  %v652_v54 = vsub.s32 1, %v2454_v7 }
 0x15d   :  { %v609_v56 = vpop.permute.xlu1 %608 }
 0x15e   :  { %v611_v58 = vpop.permute.xlu0 %610  ;;  %633 = vadd.xlane.f32.xlu1 %v632_v57  ;;  %v635_v59 = vsel %vm299_vm4, %v609_v56, 0.0 }
 0x15f   :  { %636 = vadd.xlane.f32.xlu0 %v635_v59  ;;  %v638_v61 = vsel %vm299_vm4, %v611_v58, 0.0  ;;  %v2502_v58 = vld [vmem:[%s2942_s1 + $0x20] sm:$0xff] }
 0x161   :  { %v613_v60 = vpop.permute.xlu1 %612 }
 0x162   :  { %639 = vadd.xlane.f32.xlu1 %v638_v61  ;;  %v641_v62 = vsel %vm299_vm4, %v613_v60, 0.0 }
 0x163   :  { %642 = vadd.xlane.f32.xlu0 %v641_v62 }
 0x165   :  { %v617_v63 = vpop.permute.xlu1 %616 }
 0x166   :  { %v647_v0 = vsel %vm299_vm4, %v617_v63, 0.0 }
 0x167   :  { %648 = vadd.xlane.f32.xlu0 %v647_v0 }
 0x198   :  { %v302_v1 = vpop.xlane.xlu0 %301 }
 0x19c   :  { %v615_v2 = vpop.permute.xlu0 %614 }
 0x19d   :  { %v644_v3 = vsel %vm299_vm4, %v615_v2, 0.0 }
 0x19e   :  { %645 = vadd.xlane.f32.xlu1 %v644_v3 }
 0x1a4   :  { %v305_v6 = vpop.xlane.xlu1 %304 }
 0x1a8   :  { %v314_v10 = vpop.xlane.xlu1 %313 }
 0x1ac   :  { %v320_v43 = vpop.xlane.xlu1 %319 }
 0x1cd   :  { %v308_v5 = vpop.xlane.xlu0 %307 }
 0x1d1   :  { %v311_v8 = vpop.xlane.xlu0 %310 }
 0x1d5   :  { %v317_v13 = vpop.xlane.xlu0 %316  ;;  %v280_v16 = vpop.f32.mrb[0].mxu1 }
 0x1d6   :  { %v327_v19 = vrot.slane %v280_v16, %v326_v9  ;;  %v1878_v22 = vpop.f32.mrb[1].mxu1  ;;  %v2522_v3 = vrot.slane %v280_v16, %v652_v54 }
 0x1d8   :  { %v329_v28 = vadd.f32 %v327_v19, %v305_v6  ;;  %v328_v31 = vadd.f32 %v327_v19, %v302_v1  ;;  %v331_v33 = vadd.f32 %v327_v19, %v311_v8  ;;  %v330_v34 = vadd.f32 %v327_v19, %v308_v5  ;;  %v2520_v1 = vld [vmem:[%s2942_s1 + $0x38] sm:$0xff]  ;;  %v2529_v6 = vld [vmem:[%s2942_s1 + $0x30] sm:$0xff]  ;;  %s2263_s1 = smov 8  }
 0x1d9   :  { %v323_v37 = vpop.xlane.xlu0 %322  ;;  %v333_v39 = vadd.f32 %v327_v19, %v317_v13  ;;  %v332_v40 = vadd.f32 %v327_v19, %v314_v10  ;;  %v334_v49 = vadd.f32 %v327_v19, %v320_v43 }
 0x1da   :  { %v335_v41 = vadd.f32 %v327_v19, %v323_v37  ;;  %vm337_vm10 = vcmp.gt.f32.partialorder %v329_v28, 0.0  ;;  %v345_v42 = vmul.f32 0.2, %v329_v28  ;;  %vm336_vm11 = vcmp.gt.f32.partialorder %v328_v31, 0.0 }
 0x1db   :  { %v344_v44 = vmul.f32 0.2, %v328_v31  ;;  %vm339_vm12 = vcmp.gt.f32.partialorder %v331_v33, 0.0  ;;  %v347_v45 = vmul.f32 0.2, %v331_v33  ;;  %vm338_vm13 = vcmp.gt.f32.partialorder %v330_v34, 0.0 }
 0x1dc   :  { %v353_v46 = vsel %vm337_vm10, %v329_v28, %v345_v42  ;;  %v346_v47 = vmul.f32 0.2, %v330_v34  ;;  %vm341_vm14 = vcmp.gt.f32.partialorder %v333_v39, 0.0  ;;  %v349_v53 = vmul.f32 0.2, %v333_v39 }
 0x1dd   :  { %v2490_v50 = vsel %vm361_vm5, %v353_v46, -1e+30  ;;  %v352_v51 = vsel %vm336_vm11, %v328_v31, %v344_v44  ;;  %v355_v52 = vsel %vm339_vm12, %v331_v33, %v347_v45  ;;  %v351_v59 = vmul.f32 0.2, %v335_v41 }
 0x1de   :  { %v380_v55 = vsel %vm376_vm6, %v2490_v50, -inf  ;;  %v2497_v56 = vsel %vm360_vm7, %v352_v51, -1e+30  ;;  %v354_v57 = vsel %vm338_vm13, %v330_v34, %v346_v47  ;;  %v2508_v61 = vsel %vm363_vm8, %v355_v52, -1e+30 }
 0x1df   :  { %381 = vmax.xlane.f32.xlu0 %v380_v55  ;;  %v377_v60 = vsel %vm376_vm6, %v2497_v56, -inf  ;;  %v2513_v62 = vsel %vm362_vm9, %v354_v57, -1e+30  ;;  %v357_v63 = vsel %vm341_vm14, %v333_v39, %v349_v53  ;;  %vm340_vm0 = vcmp.gt.f32.partialorder %v332_v40, 0.0 }
 0x1e0   :  { %378 = vmax.xlane.f32.xlu1 %v377_v60  ;;  %v348_v0 = vmul.f32 0.2, %v332_v40  ;;  %vm364_vm10 = vcmp.gt.f32.partialorder %v2502_v58, 0.0  ;;  %vm343_vm11 = vcmp.gt.f32.partialorder %v335_v41, 0.0  ;;  %v350_v2 = vmul.f32 0.2, %v334_v49 }
 0x1e1   :  { %v386_v4 = vsel %vm376_vm6, %v2508_v61, -inf  ;;  %vm342_vm12 = vcmp.gt.f32.partialorder %v334_v49, 0.0  ;;  %v383_v10 = vsel %vm376_vm6, %v2513_v62, -inf  ;;  %v2535_v13 = vsel %vm365_vm15, %v357_v63, -1e+30 }
 0x1e2   :  { %v356_v5 = vsel %vm340_vm0, %v332_v40, %v348_v0  ;;  %v359_v22 = vsel %vm343_vm11, %v335_v41, %v351_v59  ;;  %vm2950_vm13 = vcmp.gt.f32.partialorder %v2520_v1, 0.0  ;;  %v358_v28 = vsel %vm342_vm12, %v334_v49, %v350_v2 }
 0x1e3   :  { %v631_v8 = vpop.xlane.xlu0 %630  ;;  %387 = vmax.xlane.f32.xlu0 %v386_v4  ;;  %v2540_v19 = vsel %vm364_vm10, %v356_v5, -1e+30  ;;  %vm2949_vm14 = vcmp.gt.f32.partialorder %v2529_v6, 0.0  ;;  %v392_v33 = vsel %vm376_vm6, %v2535_v13, -inf  ;;  %v2550_v39 = vsel %vm2950_vm13, %v359_v22, -1e+30 }
 0x1e4   :  { %v655_v16 = vadd.f32 %v2522_v3, %v631_v8  ;;  %384 = vmax.xlane.f32.xlu1 %v383_v10  ;;  %v389_v37 = vsel %vm376_vm6, %v2540_v19, -inf  ;;  %v2555_v41 = vsel %vm2949_vm14, %v358_v28, -1e+30  ;;  %v398_v44 = vsel %vm376_vm6, %v2550_v39, -inf }
 0x1e5   :  { %v395_v46 = vsel %vm376_vm6, %v2555_v41, -inf }
 0x1e6   :  { %v671_v31 = vmul.f32 0.2, %v655_v16  ;;  %vm663_vm0 = vcmp.gt.f32.partialorder %v655_v16, 0.0 }
 0x1e7   :  { %v628_v34 = vpop.xlane.xlu1 %627  ;;  %393 = vmax.xlane.f32.xlu0 %v392_v33 }
 0x1e8   :  { %v654_v40 = vadd.f32 %v2522_v3, %v628_v34  ;;  %390 = vmax.xlane.f32.xlu1 %v389_v37  ;;  %v679_v42 = vsel %vm663_vm0, %v655_v16, %v671_v31 }
 0x1e9   :  { %v2563_v47 = vsel %vm361_vm5, %v679_v42, -1e+30 }
 0x1ea   :  { %v670_v43 = vmul.f32 0.2, %v654_v40  ;;  %vm662_vm11 = vcmp.gt.f32.partialorder %v654_v40, 0.0  ;;  %v697_v57 = vsel %vm376_vm6, %v2563_v47, -inf }
 0x1eb   :  { %v634_v45 = vpop.xlane.xlu1 %633  ;;  %399 = vmax.xlane.f32.xlu0 %v398_v44 }
 0x1ec   :  { %v656_v49 = vadd.f32 %v2522_v3, %v634_v45  ;;  %396 = vmax.xlane.f32.xlu1 %v395_v46  ;;  %v637_v51 = vpop.xlane.xlu0 %636  ;;  %v678_v52 = vsel %vm662_vm11, %v654_v40, %v670_v43 }
 0x1ed   :  { %v657_v53 = vadd.f32 %v2522_v3, %v637_v51  ;;  %v2569_v54 = vsel %vm360_vm7, %v678_v52, -1e+30 }
 0x1ee   :  { %v672_v55 = vmul.f32 0.2, %v656_v49  ;;  %v694_v59 = vsel %vm376_vm6, %v2569_v54, -inf  ;;  %vm664_vm12 = vcmp.gt.f32.partialorder %v656_v49, 0.0 }
 0x1ef   :  { %v673_v60 = vmul.f32 0.2, %v657_v53  ;;  %v640_v63 = vpop.xlane.xlu1 %639  ;;  %698 = vmax.xlane.f32.xlu0 %v697_v57  ;;  %vm665_vm0 = vcmp.gt.f32.partialorder %v657_v53, 0.0 }
 0x1f0   :  { %v658_v0 = vadd.f32 %v2522_v3, %v640_v63  ;;  %695 = vmax.xlane.f32.xlu1 %v694_v59  ;;  %v643_v2 = vpop.xlane.xlu0 %642  ;;  %v680_v4 = vsel %vm664_vm12, %v656_v49, %v672_v55 }
 0x1f1   :  { %v659_v5 = vadd.f32 %v2522_v3, %v643_v2  ;;  %v2579_v8 = vsel %vm362_vm9, %v680_v4, -1e+30  ;;  %v681_v10 = vsel %vm665_vm0, %v657_v53, %v673_v60 }
 0x1f2   :  { %v674_v16 = vmul.f32 0.2, %v658_v0  ;;  %v700_v22 = vsel %vm376_vm6, %v2579_v8, -inf  ;;  %v2585_v28 = vsel %vm363_vm8, %v681_v10, -1e+30  ;;  %vm666_vm11 = vcmp.gt.f32.partialorder %v658_v0, 0.0 }
 0x1f3   :  { %v675_v31 = vmul.f32 0.2, %v659_v5  ;;  %v703_v33 = vsel %vm376_vm6, %v2585_v28, -inf  ;;  %vm667_vm12 = vcmp.gt.f32.partialorder %v659_v5, 0.0 }
 0x1f4   :  { %701 = vmax.xlane.f32.xlu1 %v700_v22  ;;  %v649_v34 = vpop.xlane.xlu0 %648  ;;  %704 = vmax.xlane.f32.xlu0 %v703_v33  ;;  %v682_v37 = vsel %vm666_vm11, %v658_v0, %v674_v16 }
 0x1f5   :  { %v661_v40 = vadd.f32 %v2522_v3, %v649_v34  ;;  %v2592_v42 = vsel %vm364_vm10, %v682_v37, -1e+30  ;;  %v683_v43 = vsel %vm667_vm12, %v659_v5, %v675_v31 }
 0x1f6   :  { %v706_v44 = vsel %vm376_vm6, %v2592_v42, -inf  ;;  %v2598_v45 = vsel %vm365_vm15, %v683_v43, -1e+30 }
 0x1f7   :  { %v677_v46 = vmul.f32 0.2, %v661_v40  ;;  %v709_v49 = vsel %vm376_vm6, %v2598_v45, -inf  ;;  %vm669_vm0 = vcmp.gt.f32.partialorder %v661_v40, 0.0 }
 0x1f8   :  { %707 = vmax.xlane.f32.xlu1 %v706_v44  ;;  %710 = vmax.xlane.f32.xlu0 %v709_v49 }
 0x1f9   :  { %v685_v51 = vsel %vm669_vm0, %v661_v40, %v677_v46 }
 0x1fa   :  { %v2604_v52 = vsel %vm2950_vm13, %v685_v51, -1e+30 }
 0x1fb   :  { %v715_v53 = vsel %vm376_vm6, %v2604_v52, -inf }
 0x1fc   :  { %716 = vmax.xlane.f32.xlu0 %v715_v53 }
 0x212   :  { %2101 = vrot.lane.b32.xlu0 %v2100_v26, %s2262_s0 }
 0x22b   :  { %v646_v55 = vpop.xlane.xlu1 %645 }
 0x22c   :  { %v660_v57 = vadd.f32 %v2522_v3, %v646_v55 }
 0x22e   :  { %v676_v59 = vmul.f32 0.2, %v660_v57  ;;  %vm668_vm11 = vcmp.gt.f32.partialorder %v660_v57, 0.0 }
 0x230   :  { %v684_v60 = vsel %vm668_vm11, %v660_v57, %v676_v59 }
 0x231   :  { %v2615_v63 = vsel %vm2949_vm14, %v684_v60, -1e+30 }
 0x232   :  { %v712_v0 = vsel %vm376_vm6, %v2615_v63, -inf }
 0x233   :  { %713 = vmax.xlane.f32.xlu1 %v712_v0 }
 0x244   :  { %2096 = vrot.lane.b32.xlu1 %v2095_v21, %s2262_s0 }
 0x26c   :  { %v382_v23 = vpop.xlane.xlu0 %381 }
 0x26d   :  { %v402_v25 = vsub.f32 %v2490_v50, %v382_v23  ;;  %v379_v26 = vpop.xlane.xlu1 %378 }
 0x26e   :  { %v401_v3 = vsub.f32 %v2497_v56, %v379_v26 }
 0x26f   :  { %v411_v2 = vmul.f32 1.442695, %v402_v25 }
 0x270   :  { %v409_v4 = vmul.f32 1.442695, %v401_v3  ;;  %v388_v5 = vpop.xlane.xlu0 %387 }
 0x271   :  { %2115 = vpow2.f32 %v411_v2  ;;  %v404_v10 = vsub.f32 %v2508_v61, %v388_v5  ;;  %v385_v16 = vpop.xlane.xlu1 %384 }
 0x272   :  { %2117 = vpow2.f32 %v409_v4  ;;  %v403_v22 = vsub.f32 %v2513_v62, %v385_v16 }
 0x273   :  { %v415_v31 = vmul.f32 1.442695, %v404_v10 }
 0x274   :  { %v413_v33 = vmul.f32 1.442695, %v403_v22  ;;  %v394_v17 = vpop.xlane.xlu0 %393 }
 0x275   :  { %2119 = vpow2.f32 %v415_v31  ;;  %v406_v18 = vsub.f32 %v2535_v13, %v394_v17  ;;  %v391_v21 = vpop.xlane.xlu1 %390 }
 0x276   :  { %2121 = vpow2.f32 %v413_v33  ;;  %v405_v50 = vsub.f32 %v2540_v19, %v391_v21 }
 0x277   :  { %v419_v56 = vmul.f32 1.442695, %v406_v18 }
 0x278   :  { %v417_v34 = vmul.f32 1.442695, %v405_v50  ;;  %v400_v37 = vpop.xlane.xlu0 %399 }
 0x279   :  { %2123 = vpow2.f32 %v419_v56  ;;  %v408_v61 = vsub.f32 %v2550_v39, %v400_v37  ;;  %v397_v40 = vpop.xlane.xlu1 %396 }
 0x27a   :  { %2125 = vpow2.f32 %v417_v34  ;;  %v407_v62 = vsub.f32 %v2555_v41, %v397_v40 }
 0x27b   :  { %v2631_v43 = vpop.eup %2115  ;;  %v423_v44 = vmul.f32 1.442695, %v408_v61 }
 0x27c   :  { %v2633_v46 = vpop.eup %2117  ;;  %v421_v13 = vmul.f32 1.442695, %v407_v62  ;;  %v699_v49 = vpop.xlane.xlu0 %698  ;;  %v428_v19 = vsel %vm376_vm6, %v2631_v43, 0.0 }
 0x27d   :  { %2127 = vpow2.f32 %v423_v44  ;;  %v719_v51 = vsub.f32 %v2563_v47, %v699_v49  ;;  %v696_v53 = vpop.xlane.xlu1 %695  ;;  %429 = vadd.xlane.f32.xlu0 %v428_v19  ;;  %v425_v39 = vsel %vm376_vm6, %v2633_v46, 0.0 }
 0x27e   :  { %2129 = vpow2.f32 %v421_v13  ;;  %v718_v41 = vsub.f32 %v2569_v54, %v696_v53  ;;  %426 = vadd.xlane.f32.xlu1 %v425_v39 }
 0x27f   :  { %v2641_v55 = vpop.eup %2119  ;;  %v728_v57 = vmul.f32 1.442695, %v719_v51 }
 0x280   :  { %v2643_v59 = vpop.eup %2121  ;;  %v726_v60 = vmul.f32 1.442695, %v718_v41  ;;  %v434_v0 = vsel %vm376_vm6, %v2641_v55, 0.0 }
 0x281   :  { %2131 = vpow2.f32 %v728_v57  ;;  %v702_v47 = vpop.xlane.xlu1 %701  ;;  %435 = vadd.xlane.f32.xlu0 %v434_v0  ;;  %v705_v23 = vpop.xlane.xlu0 %704  ;;  %v431_v25 = vsel %vm376_vm6, %v2643_v59, 0.0 }
 0x282   :  { %2133 = vpow2.f32 %v726_v60  ;;  %v720_v54 = vsub.f32 %v2579_v8, %v702_v47  ;;  %v721_v26 = vsub.f32 %v2585_v28, %v705_v23  ;;  %432 = vadd.xlane.f32.xlu1 %v431_v25 }
 0x283   :  { %v2651_v3 = vpop.eup %2123 }
 0x284   :  { %v2653_v2 = vpop.eup %2125  ;;  %v730_v4 = vmul.f32 1.442695, %v720_v54  ;;  %v732_v5 = vmul.f32 1.442695, %v721_v26  ;;  %v440_v10 = vsel %vm376_vm6, %v2651_v3, 0.0 }
 0x285   :  { %v708_v16 = vpop.xlane.xlu1 %707  ;;  %441 = vadd.xlane.f32.xlu0 %v440_v10  ;;  %v711_v22 = vpop.xlane.xlu0 %710  ;;  %v437_v31 = vsel %vm376_vm6, %v2653_v2, 0.0 }
 0x286   :  { %2135 = vpow2.f32 %v730_v4  ;;  %v722_v8 = vsub.f32 %v2592_v42, %v708_v16  ;;  %v723_v28 = vsub.f32 %v2598_v45, %v711_v22  ;;  %438 = vadd.xlane.f32.xlu1 %v437_v31 }
 0x287   :  { %v2661_v33 = vpop.eup %2127  ;;  %2137 = vpow2.f32 %v732_v5 }
 0x288   :  { %v2663_v17 = vpop.eup %2129  ;;  %v734_v18 = vmul.f32 1.442695, %v722_v8  ;;  %v736_v21 = vmul.f32 1.442695, %v723_v28  ;;  %v446_v50 = vsel %vm376_vm6, %v2661_v33, 0.0 }
 0x289   :  { %447 = vadd.xlane.f32.xlu0 %v446_v50  ;;  %v443_v56 = vsel %vm376_vm6, %v2663_v17, 0.0  ;;  %v717_v53 = vpop.xlane.xlu0 %716 }
 0x28a   :  { %2139 = vpow2.f32 %v734_v18  ;;  %444 = vadd.xlane.f32.xlu1 %v443_v56  ;;  %v725_v39 = vsub.f32 %v2604_v52, %v717_v53 }
 0x28b   :  { %v2669_v42 = vpop.eup %2131  ;;  %2141 = vpow2.f32 %v736_v21 }
 0x28c   :  { %v2671_v45 = vpop.eup %2133  ;;  %v745_v34 = vsel %vm376_vm6, %v2669_v42, 0.0  ;;  %v740_v41 = vmul.f32 1.442695, %v725_v39 }
 0x28d   :  { %746 = vadd.xlane.f32.xlu0 %v745_v34  ;;  %v742_v37 = vsel %vm376_vm6, %v2671_v45, 0.0 }
 0x28e   :  { %743 = vadd.xlane.f32.xlu1 %v742_v37  ;;  %2143 = vpow2.f32 %v740_v41 }
 0x290   :  { %v2677_v61 = vpop.eup %2135 }
 0x291   :  { %v2679_v40 = vpop.eup %2137  ;;  %v748_v62 = vsel %vm376_vm6, %v2677_v61, 0.0 }
 0x292   :  { %749 = vadd.xlane.f32.xlu1 %v748_v62  ;;  %v751_v44 = vsel %vm376_vm6, %v2679_v40, 0.0 }
 0x293   :  { %752 = vadd.xlane.f32.xlu0 %v751_v44 }
 0x294   :  { %v2685_v13 = vpop.eup %2139 }
 0x295   :  { %v2687_v49 = vpop.eup %2141  ;;  %v754_v19 = vsel %vm376_vm6, %v2685_v13, 0.0 }
 0x296   :  { %755 = vadd.xlane.f32.xlu1 %v754_v19  ;;  %v757_v51 = vsel %vm376_vm6, %v2687_v49, 0.0 }
 0x297   :  { %758 = vadd.xlane.f32.xlu0 %v757_v51 }
 0x298   :  { %v2703_v30 = vpop.eup %2143 }
 0x2a7   :  { %2106 = vrot.lane.b32.xlu1 %v2105_v32, %s2262_s0  ;;  %v763_v32 = vsel %vm376_vm6, %v2703_v30, 0.0 }
 0x2ad   :  { %2111 = vrot.lane.b32.xlu0 %v2110_v38, %s2262_s0  ;;  %v2102_v38 = vpop.permute.xlu0 %2101 }
 0x2ae   :  { %v2104_v22 = vunpack.i.h.bf16 %v2102_v38  ;;  %v2103_v31 = vunpack.i.l.bf16 %v2102_v38 }
 0x2b0   :  { %v2042_v34 = vpack.c.bf16 %v2104_v22, %v2103_v31 }
 0x2c0   :  { %v714_v57 = vpop.xlane.xlu1 %713 }
 0x2c1   :  { %v724_v60 = vsub.f32 %v2615_v63, %v714_v57 }
 0x2c3   :  { %v738_v0 = vmul.f32 1.442695, %v724_v60 }
 0x2c4   :  { %v2097_v47 = vpop.permute.xlu1 %2096 }
 0x2c5   :  { %2145 = vpow2.f32 %v738_v0  ;;  %v2099_v23 = vunpack.i.h.bf16 %v2097_v47  ;;  %v2098_v25 = vunpack.i.l.bf16 %v2097_v47 }
 0x2c7   :  { %v2038_v29 = vpack.c.bf16 %v2099_v23, %v2098_v25 }
 0x2c9   :  { %2039 = vmatprep.subr.bf16.mxu0 %v2038_v29 }
 0x2cc   :  { %764 = vadd.xlane.f32.xlu0 %v763_v32 }
 0x2cf   :  { %v2707_v35 = vpop.eup %2145 }
 0x2d0   :  { %v760_v36 = vsel %vm376_vm6, %v2707_v35, 0.0 }
 0x2d1   :  { %761 = vadd.xlane.f32.xlu1 %v760_v36 }
 0x30a   :  { %v430_v52 = vpop.xlane.xlu0 %429 }
 0x30b   :  { %2147 = vrcp.f32 %v430_v52  ;;  %v427_v63 = vpop.xlane.xlu1 %426 }
 0x30c   :  { %2149 = vrcp.f32 %v427_v63 }
 0x30e   :  { %v436_v54 = vpop.xlane.xlu0 %435 }
 0x30f   :  { %2151 = vrcp.f32 %v436_v54  ;;  %v433_v26 = vpop.xlane.xlu1 %432 }
 0x310   :  { %2153 = vrcp.f32 %v433_v26 }
 0x312   :  { %v442_v4 = vpop.xlane.xlu0 %441 }
 0x313   :  { %2155 = vrcp.f32 %v442_v4  ;;  %v439_v5 = vpop.xlane.xlu1 %438 }
 0x314   :  { %2157 = vrcp.f32 %v439_v5 }
 0x315   :  { %v2148_v10 = vpop.eup %2147 }
 0x316   :  { %v2150_v16 = vpop.eup %2149  ;;  %v458_v8 = vmul.f32 %v2148_v10, %v2631_v43  ;;  %v448_v28 = vpop.xlane.xlu0 %447 }
 0x317   :  { %2159 = vrcp.f32 %v448_v28  ;;  %v445_v18 = vpop.xlane.xlu1 %444  ;;  %v457_v21 = vmul.f32 %v2150_v16, %v2633_v46 }
 0x318   :  { %2161 = vrcp.f32 %v445_v18 }
 0x319   :  { %v2152_v50 = vpop.eup %2151  ;;  %1895 = vmatprep.mubr.msk.f32.mxu0 %vm376_vm6, %v457_v21 }
 0x31a   :  { %v2154_v56 = vpop.eup %2153  ;;  %1896 = vmatmul.mubr.msk.f32.vlgmr.msra.gmra.mrb[8].mxu0 %vm376_vm6, %v458_v8  ;;  %v747_v37 = vpop.xlane.xlu0 %746  ;;  %v460_v62 = vmul.f32 %v2152_v50, %v2641_v55 }
 0x31b   :  { %2041 = vmatpush3.bf16.msra.mxu0 %v2038_v29  ;;  %v744_v44 = vpop.xlane.xlu1 %743  ;;  %v459_v43 = vmul.f32 %v2154_v56, %v2643_v59 }
 0x31c   :  { %2163 = vrcp.f32 %v744_v44  ;;  %2043 = vmatprep.subr.bf16.mxu0 %v2042_v34 }
 0x31d   :  { %v2156_v19 = vpop.eup %2155  ;;  %1898 = vmatprep.mubr.msk.f32.mxu0 %vm376_vm6, %v459_v43  ;;  %2165 = vrcp.f32 %v747_v37 }
 0x31e   :  { %v2158_v46 = vpop.eup %2157  ;;  %1899 = vmatmul.mubr.msk.f32.gmra.mrb[10].mxu0 %vm376_vm6, %v460_v62  ;;  %v462_v51 = vmul.f32 %v2156_v19, %v2651_v3 }
 0x31f   :  { %2045 = vmatpush3.bf16.msra.mxu0 %v2042_v34  ;;  %v750_v53 = vpop.xlane.xlu1 %749  ;;  %v461_v39 = vmul.f32 %v2158_v46, %v2653_v2  ;;  %v1038_v46 = vld [vmem:[%s2943_s6] sm:$0xff] }
 0x320   :  { %v753_v41 = vpop.xlane.xlu0 %752  ;;  %2167 = vrcp.f32 %v750_v53 }
 0x321   :  { %v2160_v55 = vpop.eup %2159  ;;  %1901 = vmatprep.mubr.msk.f32.mxu0 %vm376_vm6, %v461_v39  ;;  %2169 = vrcp.f32 %v753_v41 }
 0x322   :  { %v2162_v57 = vpop.eup %2161  ;;  %1902 = vmatmul.mubr.msk.f32.gmra.mrb[12].mxu0 %vm376_vm6, %v462_v51  ;;  %v464_v59 = vmul.f32 %v2160_v55, %v2661_v33  ;;  %v1039_v51 = vld [vmem:[%s2943_s6 + $0x8] sm:$0xff]  ;;  %v2757_v55 = vld [vmem:[%s2944_s5] ss:$0 sm:$0xff] }
 0x323   :  { %v756_v60 = vpop.xlane.xlu1 %755  ;;  %v463_v0 = vmul.f32 %v2162_v57, %v2663_v17  ;;  %v2054_v53 = vpack.c.bf16 %v1039_v51, %v1038_v46 }
 0x324   :  { %v759_v47 = vpop.xlane.xlu0 %758  ;;  %2171 = vrcp.f32 %v756_v60 }
 0x325   :  { %1904 = vmatprep.mubr.msk.f32.mxu0 %vm376_vm6, %v463_v0  ;;  %2173 = vrcp.f32 %v759_v47  ;;  %2055 = vmatprep.subr.bf16.mxu1 %v2054_v53 }
 0x326   :  { %v2164_v3 = vpop.eup %2163  ;;  %1905 = vmatmul.mubr.msk.f32.gmra.mrb[14].mxu0 %vm376_vm6, %v464_v59  ;;  %2057 = vmatpush3.bf16.msra.mxu1 %v2054_v53 }
 0x327   :  { %v2107_v2 = vpop.permute.xlu1 %2106  ;;  %v774_v23 = vmul.f32 %v2164_v3, %v2671_v45  ;;  %v2166_v52 = vpop.eup %2165  ;;  %2058 = vmatprep.subr.bf16.mxu1 %v2259_v14 }
 0x328   :  { %v2109_v25 = vunpack.i.h.bf16 %v2107_v2  ;;  %v2108_v29 = vunpack.i.l.bf16 %v2107_v2  ;;  %v2112_v32 = vpop.permute.xlu0 %2111  ;;  %v775_v45 = vmul.f32 %v2166_v52, %v2669_v42 }
 0x329   :  { %v2114_v36 = vunpack.i.h.bf16 %v2112_v32  ;;  %v2113_v33 = vunpack.i.l.bf16 %v2112_v32  ;;  %1923 = vmatprep.mubr.msk.f32.mxu0 %vm376_vm6, %v774_v23 }
 0x32a   :  { %v2046_v17 = vpack.c.bf16 %v2109_v25, %v2108_v29  ;;  %v2168_v63 = vpop.eup %2167 }
 0x32b   :  { %v2050_v38 = vpack.c.bf16 %v2114_v36, %v2113_v33  ;;  %v2170_v54 = vpop.eup %2169  ;;  %v776_v26 = vmul.f32 %v2168_v63, %v2677_v61 }
 0x32c   :  { %2047 = vmatprep.subr.bf16.mxu0 %v2046_v17  ;;  %v777_v5 = vmul.f32 %v2170_v54, %v2679_v40 }
 0x32d   :  { %2049 = vmatpush3.bf16.msra.mxu0 %v2046_v17 }
 0x32e   :  { %2051 = vmatprep.subr.bf16.mxu0 %v2050_v38  ;;  %v2172_v4 = vpop.eup %2171 }
 0x32f   :  { %v2174_v10 = vpop.eup %2173  ;;  %v778_v16 = vmul.f32 %v2172_v4, %v2685_v13 }
 0x330   :  { %v779_v22 = vmul.f32 %v2174_v10, %v2687_v49 }
 0x331   :  { %2053 = vmatpush3.bf16.msra.mxu0 %v2050_v38 }
 0x334   :  { %1924 = vmatmul.mubr.msk.f32.vlgmr.msra.gmra.mrb[16].mxu0 %vm376_vm6, %v775_v45 }
 0x335   :  { %1926 = vmatprep.mubr.msk.f32.mxu0 %vm376_vm6, %v776_v26 }
 0x338   :  { %1927 = vmatmul.mubr.msk.f32.gmra.mrb[18].mxu0 %vm376_vm6, %v777_v5 }
 0x339   :  { %1929 = vmatprep.mubr.msk.f32.mxu0 %vm376_vm6, %v778_v16 }
 0x33c   :  { %1930 = vmatmul.mubr.msk.f32.gmra.mrb[20].mxu0 %vm376_vm6, %v779_v22 }
 0x359   :  { %v765_v42 = vpop.xlane.xlu0 %764 }
 0x35a   :  { %2175 = vrcp.f32 %v765_v42 }
 0x35e   :  { %v762_v61 = vpop.xlane.xlu1 %761 }
 0x35f   :  { %2177 = vrcp.f32 %v762_v61 }
 0x364   :  { %v2176_v31 = vpop.eup %2175 }
 0x365   :  { %v781_v40 = vmul.f32 %v2176_v31, %v2703_v30 }
 0x369   :  { %v2178_v8 = vpop.eup %2177 }
 0x36a   :  { %v780_v28 = vmul.f32 %v2178_v8, %v2707_v35 }
 0x36c   :  { %1932 = vmatprep.mubr.msk.f32.mxu0 %vm376_vm6, %v780_v28 }
 0x36d   :  { %1933 = vmatmul.mubr.msk.f32.gmra.mrb[22].mxu0 %vm376_vm6, %v781_v40 }
 0x3ed   :  { %v1897_v13 = vpop.f32.mrb[8].mxu0 }
 0x3ee   :  { %v555_v18 = vpop.f32.mrb[9].mxu0 }
 0x3f1   :  { %v1900_v21 = vpop.f32.mrb[10].mxu0 }
 0x3f2   :  { %v565_v49 = vpop.f32.mrb[11].mxu0 }
 0x3f5   :  { %v1903_v50 = vpop.f32.mrb[12].mxu0 }
 0x3f6   :  { %v575_v56 = vpop.f32.mrb[13].mxu0 }
 0x3f9   :  { %v2743_v34 = vpop.f32.mrb[14].mxu0 }
 0x3fa   :  { %v2745_v37 = vpop.f32.mrb[15].mxu0 }
 0x407   :  { %v1925_v62 = vpop.f32.mrb[16].mxu0 }
 0x408   :  { %945 = vrot.lane.b32.xlu0 %v1925_v62, %s2263_s1  ;;  %v896_v35 = vpop.f32.mrb[17].mxu0 }
 0x409   :  { %943 = vrot.lane.b32.xlu1 %v896_v35, %s2263_s1 }
 0x40b   :  { %v1928_v30 = vpop.f32.mrb[18].mxu0 }
 0x40c   :  { %v906_v44 = vpop.f32.mrb[19].mxu0 }
 0x40d   :  { %947 = vrot.lane.b32.xlu1 %v906_v44, %s2263_s1 }
 0x40f   :  { %v1931_v43 = vpop.f32.mrb[20].mxu0 }
 0x410   :  { %v916_v19 = vpop.f32.mrb[21].mxu0 }
 0x411   :  { %949 = vrot.lane.b32.xlu1 %v1928_v30, %s2263_s1  ;;  %951 = vrot.lane.b32.xlu0 %v916_v19, %s2263_s1 }
 0x415   :  { %953 = vrot.lane.b32.xlu1 %v1931_v43, %s2263_s1 }
 0x440   :  { %v1934_v39 = vpop.f32.mrb[22].mxu0 }
 0x441   :  { %957 = vrot.lane.b32.xlu1 %v1934_v39, %s2263_s1  ;;  %v926_v41 = vpop.f32.mrb[23].mxu0 }
 0x442   :  { %955 = vrot.lane.b32.xlu0 %v926_v41, %s2263_s1 }
 0x47a   :  { %v946_v57 = vpop.permute.xlu0 %945 }
 0x47b   :  { %v968_v59 = vsel %vm299_vm4, %v1897_v13, %v946_v57  ;;  %v944_v60 = vpop.permute.xlu1 %943 }
 0x47c   :  { %v983_v0 = vadd.f32 %v2757_v55, %v968_v59  ;;  %v967_v47 = vsel %vm299_vm4, %v555_v18, %v944_v60 }
 0x47d   :  { %v982_v3 = vadd.f32 %v2757_v55, %v967_v47 }
 0x47e   :  { %v999_v2 = vmin.f32 %v983_v0, 0.0  ;;  %vm991_vm0 = vcmp.gt.f32.partialorder %v983_v0, 0.0 }
 0x47f   :  { %v998_v23 = vmin.f32 %v982_v3, 0.0  ;;  %v948_v25 = vpop.permute.xlu1 %947  ;;  %vm990_vm12 = vcmp.gt.f32.partialorder %v982_v3, 0.0 }
 0x480   :  { %v1008_v29 = vmul.f32 1.442695, %v999_v2  ;;  %v969_v32 = vsel %vm299_vm4, %v565_v49, %v948_v25 }
 0x481   :  { %v1006_v36 = vmul.f32 1.442695, %v998_v23  ;;  %v984_v33 = vadd.f32 %v2757_v55, %v969_v32 }
 0x482   :  { %2179 = vpow2.f32 %v1008_v29 }
 0x483   :  { %2181 = vpow2.f32 %v1006_v36  ;;  %v1000_v17 = vmin.f32 %v984_v33, 0.0  ;;  %v950_v38 = vpop.permute.xlu1 %949  ;;  %v952_v52 = vpop.permute.xlu0 %951  ;;  %vm992_vm11 = vcmp.gt.f32.partialorder %v984_v33, 0.0 }
 0x484   :  { %v970_v63 = vsel %vm299_vm4, %v1900_v21, %v950_v38  ;;  %v971_v45 = vsel %vm299_vm4, %v575_v56, %v952_v52 }
 0x485   :  { %v1010_v54 = vmul.f32 1.442695, %v1000_v17  ;;  %v985_v26 = vadd.f32 %v2757_v55, %v970_v63  ;;  %v986_v4 = vadd.f32 %v2757_v55, %v971_v45 }
 0x487   :  { %2183 = vpow2.f32 %v1010_v54  ;;  %v1001_v5 = vmin.f32 %v985_v26, 0.0  ;;  %v1002_v10 = vmin.f32 %v986_v4, 0.0  ;;  %v954_v16 = vpop.permute.xlu1 %953  ;;  %vm993_vm14 = vcmp.gt.f32.partialorder %v985_v26, 0.0 }
 0x488   :  { %v972_v22 = vsel %vm299_vm4, %v1903_v50, %v954_v16  ;;  %vm994_vm13 = vcmp.gt.f32.partialorder %v986_v4, 0.0 }
 0x489   :  { %v1012_v42 = vmul.f32 1.442695, %v1001_v5  ;;  %v1014_v61 = vmul.f32 1.442695, %v1002_v10  ;;  %v987_v31 = vadd.f32 %v2757_v55, %v972_v22 }
 0x48b   :  { %2185 = vpow2.f32 %v1012_v42  ;;  %v1003_v8 = vmin.f32 %v987_v31, 0.0 }
 0x48c   :  { %v2180_v28 = vpop.eup %2179  ;;  %2187 = vpow2.f32 %v1014_v61 }
 0x48d   :  { %v2182_v40 = vpop.eup %2181  ;;  %v1016_v13 = vmul.f32 1.442695, %v1003_v8  ;;  %v1718_v18 = vadd.f32 -1.0, %v2180_v28 }
 0x48e   :  { %v1717_v21 = vadd.f32 -1.0, %v2182_v40 }
 0x48f   :  { %2189 = vpow2.f32 %v1016_v13  ;;  %v1031_v50 = vsel %vm991_vm0, %v983_v0, %v1718_v18 }
 0x490   :  { %v1030_v49 = vsel %vm990_vm12, %v982_v3, %v1717_v21  ;;  %vm995_vm12 = vcmp.gt.f32.partialorder %v987_v31, 0.0 }
 0x491   :  { %v2184_v56 = vpop.eup %2183  ;;  %1939 = vmatprep.mubr.msk.f32.mxu1 %vm186_vm2, %v1030_v49 }
 0x492   :  { %1940 = vmatmul.mubr.msk.f32.vlgmr.msra.gmra.mrb[2].mxu1 %vm186_vm2, %v1031_v50  ;;  %v1719_v62 = vadd.f32 -1.0, %v2184_v56 }
 0x494   :  { %v1032_v35 = vsel %vm992_vm11, %v984_v33, %v1719_v62 }
 0x495   :  { %v2186_v30 = vpop.eup %2185  ;;  %1942 = vmatprep.mubr.msk.f32.mxu1 %vm186_vm2, %v1032_v35 }
 0x496   :  { %v2188_v44 = vpop.eup %2187  ;;  %v1720_v43 = vadd.f32 -1.0, %v2186_v30 }
 0x497   :  { %v1721_v19 = vadd.f32 -1.0, %v2188_v44 }
 0x498   :  { %v1033_v46 = vsel %vm993_vm14, %v985_v26, %v1720_v43 }
 0x499   :  { %v2190_v51 = vpop.eup %2189  ;;  %1943 = vmatmul.mubr.msk.f32.gmra.mrb[4].mxu1 %vm186_vm2, %v1033_v46  ;;  %v1034_v53 = vsel %vm994_vm13, %v986_v4, %v1721_v19 }
 0x49a   :  { %1945 = vmatprep.mubr.msk.f32.mxu1 %vm186_vm2, %v1034_v53  ;;  %v1722_v39 = vadd.f32 -1.0, %v2190_v51 }
 0x49c   :  { %v1035_v41 = vsel %vm995_vm12, %v987_v31, %v1722_v39 }
 0x49d   :  { %1946 = vmatmul.mubr.msk.f32.gmra.mrb[6].mxu1 %vm186_vm2, %v1035_v41 }
 0x4b3   :  { %v958_v57 = vpop.permute.xlu1 %957 }
 0x4b4   :  { %v974_v59 = vsel %vm299_vm4, %v2743_v34, %v958_v57  ;;  %v956_v60 = vpop.permute.xlu0 %955 }
 0x4b5   :  { %v989_v0 = vadd.f32 %v2757_v55, %v974_v59  ;;  %v973_v47 = vsel %vm299_vm4, %v2745_v37, %v956_v60  ;;  %v1742_v37 = vld [vmem:[%s2945_s8] ss:$0 sm:$0xff] }
 0x4b6   :  { %v988_v3 = vadd.f32 %v2757_v55, %v973_v47 }
 0x4b7   :  { %v1005_v2 = vmin.f32 %v989_v0, 0.0  ;;  %vm997_vm14 = vcmp.gt.f32.partialorder %v989_v0, 0.0 }
 0x4b8   :  { %v1004_v23 = vmin.f32 %v988_v3, 0.0  ;;  %vm996_vm13 = vcmp.gt.f32.partialorder %v988_v3, 0.0 }
 0x4b9   :  { %v1020_v25 = vmul.f32 1.442695, %v1005_v2 }
 0x4ba   :  { %v1018_v29 = vmul.f32 1.442695, %v1004_v23 }
 0x4bb   :  { %2191 = vpow2.f32 %v1020_v25 }
 0x4bc   :  { %2193 = vpow2.f32 %v1018_v29 }
 0x4c5   :  { %v2192_v32 = vpop.eup %2191 }
 0x4c6   :  { %v2194_v36 = vpop.eup %2193  ;;  %v1724_v33 = vadd.f32 -1.0, %v2192_v32 }
 0x4c7   :  { %v1723_v17 = vadd.f32 -1.0, %v2194_v36 }
 0x4c8   :  { %v1037_v38 = vsel %vm997_vm14, %v989_v0, %v1724_v33 }
 0x4c9   :  { %v1036_v34 = vsel %vm996_vm13, %v988_v3, %v1723_v17 }
 0x4ca   :  { %1948 = vmatprep.mubr.msk.f32.mxu1 %vm186_vm2, %v1036_v34 }
 0x4cb   :  { %1949 = vmatmul.mubr.msk.f32.gmra.mrb[8].mxu1 %vm186_vm2, %v1037_v38 }
 0x4cc   :  { %1967 = vmatprep.mubr.msk.f32.mxu1 %vm2260_vm1, %v2261_v15 }
 0x565   :  { %v1941_v55 = vpop.f32.mrb[2].mxu1 }
 0x566   :  { %v1275_v52 = vmul.f32 %v1941_v55, %v1742_v37  ;;  %v1130_v63 = vpop.f32.mrb[3].mxu1 }
 0x567   :  { %v2059_v45 = vpack.c.bf16 %v1941_v55, %v1130_v63  ;;  %v1274_v54 = vmul.f32 %v1742_v37, %v1130_v63 }
 0x568   :  { %v1285_v26 = vsel %vm186_vm2, %v1275_v52, 0.0 }
 0x569   :  { %1286 = vadd.xlane.f32.xlu1 %v1285_v26  ;;  %2061 = vmatpush3.bf16.xpose.msk.msra.mxu1 %vm2376_vm3, %v2059_v45  ;;  %v1282_v4 = vsel %vm186_vm2, %v1274_v54, 0.0 }
 0x56a   :  { %2075 = vmatprep.subr.bf16.mxu0 %v2059_v45  ;;  %1283 = vadd.xlane.f32.xlu0 %v1282_v4 }
 0x56b   :  { %2077 = vmatpush3.bf16.msra.mxu0 %v2059_v45  ;;  %2062 = vmatprep.subr.bf16.mxu1 %v2259_v14 }
 0x56c   :  { %v1944_v15 = vpop.f32.mrb[4].mxu1 }
 0x56d   :  { %v1140_v5 = vpop.f32.mrb[5].mxu1  ;;  %v1277_v22 = vmul.f32 %v1944_v15, %v1742_v37 }
 0x56e   :  { %v2063_v10 = vpack.c.bf16 %v1944_v15, %v1140_v5  ;;  %v1276_v16 = vmul.f32 %v1742_v37, %v1140_v5 }
 0x56f   :  { %v1291_v13 = vsel %vm186_vm2, %v1277_v22, 0.0 }
 0x570   :  { %v1947_v42 = vpop.f32.mrb[6].mxu1  ;;  %2079 = vmatprep.subr.bf16.mxu0 %v2063_v10  ;;  %v1288_v61 = vsel %vm186_vm2, %v1276_v16, 0.0 }
 0x571   :  { %1289 = vadd.xlane.f32.xlu0 %v1288_v61  ;;  %v1150_v31 = vpop.f32.mrb[7].mxu1  ;;  %2065 = vmatpush3.bf16.xpose.msk.msra.mxu1 %vm2376_vm3, %v2063_v10  ;;  %v1279_v40 = vmul.f32 %v1947_v42, %v1742_v37 }
 0x572   :  { %v2067_v8 = vpack.c.bf16 %v1947_v42, %v1150_v31  ;;  %v1278_v28 = vmul.f32 %v1742_v37, %v1150_v31  ;;  %2081 = vmatpush3.bf16.msra.mxu0 %v2063_v10  ;;  %2066 = vmatprep.subr.bf16.mxu1 %v2259_v14 }
 0x573   :  { %v1297_v21 = vsel %vm186_vm2, %v1279_v40, 0.0 }
 0x574   :  { %2083 = vmatprep.subr.bf16.mxu0 %v2067_v8  ;;  %v1294_v18 = vsel %vm186_vm2, %v1278_v28, 0.0 }
 0x575   :  { %1292 = vadd.xlane.f32.xlu0 %v1291_v13  ;;  %1295 = vadd.xlane.f32.xlu1 %v1294_v18 }
 0x576   :  { %2085 = vmatpush3.bf16.msra.mxu0 %v2067_v8 }
 0x579   :  { %1298 = vadd.xlane.f32.xlu0 %v1297_v21  ;;  %2069 = vmatpush3.bf16.xpose.msk.msra.mxu1 %vm2376_vm3, %v2067_v8 }
 0x57a   :  { %2070 = vmatprep.subr.bf16.mxu1 %v2259_v14  ;;  %v1169_v14 = vld [vmem:[%s2946_s7] sm:$0x1] }
 0x59e   :  { %v1950_v49 = vpop.f32.mrb[8].mxu1 }
 0x59f   :  { %v1281_v56 = vmul.f32 %v1950_v49, %v1742_v37  ;;  %v1160_v50 = vpop.f32.mrb[9].mxu1 }
 0x5a0   :  { %v2071_v62 = vpack.c.bf16 %v1950_v49, %v1160_v50  ;;  %v1280_v35 = vmul.f32 %v1742_v37, %v1160_v50 }
 0x5a1   :  { %v1303_v30 = vsel %vm186_vm2, %v1281_v56, 0.0 }
 0x5a2   :  { %1304 = vadd.xlane.f32.xlu0 %v1303_v30  ;;  %2073 = vmatpush3.bf16.xpose.msk.msra.mxu1 %vm2376_vm3, %v2071_v62  ;;  %v1300_v44 = vsel %vm186_vm2, %v1280_v35, 0.0 }
 0x5a3   :  { %2087 = vmatprep.subr.bf16.mxu0 %v2071_v62  ;;  %1301 = vadd.xlane.f32.xlu1 %v1300_v44 }
 0x5a4   :  { %2089 = vmatpush3.bf16.msra.mxu0 %v2071_v62 }
 0x5a9   :  { %1968 = vmatmul.mubr.msk.f32.vlgmr.msra.gmra.mrb[10].mxu1 %vm186_vm2, %v1169_v14 }
 0x5f6   :  { %v1287_v51 = vpop.xlane.xlu1 %1286 }
 0x5f7   :  { %v1284_v43 = vpop.xlane.xlu0 %1283 }
 0x5fe   :  { %v1290_v19 = vpop.xlane.xlu0 %1289 }
 0x602   :  { %v1293_v46 = vpop.xlane.xlu0 %1292  ;;  %v1296_v53 = vpop.xlane.xlu1 %1295 }
 0x606   :  { %v1299_v39 = vpop.xlane.xlu0 %1298 }
 0x62f   :  { %v1305_v59 = vpop.xlane.xlu0 %1304 }
 0x630   :  { %v1302_v60 = vpop.xlane.xlu1 %1301 }
 0x67c   :  { %v1263_v41 = vpop.f32.mrb[10].mxu1 }
 0x67d   :  { %v1309_v20 = vrot.slane %v1263_v41, %v326_v9  ;;  %v1969_v57 = vpop.f32.mrb[11].mxu1 }
 0x67f   :  { %v1311_v0 = vadd.f32 %v1309_v20, %v1287_v51  ;;  %v1310_v47 = vadd.f32 %v1309_v20, %v1284_v43  ;;  %v1313_v3 = vadd.f32 %v1309_v20, %v1293_v46  ;;  %v1312_v2 = vadd.f32 %v1309_v20, %v1290_v19 }
 0x680   :  { %v1315_v23 = vadd.f32 %v1309_v20, %v1299_v39  ;;  %v1314_v25 = vadd.f32 %v1309_v20, %v1296_v53  ;;  %v1317_v29 = vadd.f32 %v1309_v20, %v1305_v59  ;;  %v1316_v32 = vadd.f32 %v1309_v20, %v1302_v60 }
 0x681   :  { %vm1319_vm1 = vcmp.gt.f32.partialorder %v1311_v0, 0.0  ;;  %v1327_v36 = vmul.f32 0.2, %v1311_v0  ;;  %vm1318_vm3 = vcmp.gt.f32.partialorder %v1310_v47, 0.0  ;;  %v1326_v33 = vmul.f32 0.2, %v1310_v47 }
 0x682   :  { %vm1321_vm4 = vcmp.gt.f32.partialorder %v1313_v3, 0.0  ;;  %v1329_v17 = vmul.f32 0.2, %v1313_v3  ;;  %vm1320_vm0 = vcmp.gt.f32.partialorder %v1312_v2, 0.0  ;;  %v1328_v7 = vmul.f32 0.2, %v1312_v2 }
 0x683   :  { %v1335_v9 = vsel %vm1319_vm1, %v1311_v0, %v1327_v36  ;;  %v1334_v34 = vsel %vm1318_vm3, %v1310_v47, %v1326_v33  ;;  %vm1323_vm11 = vcmp.gt.f32.partialorder %v1315_v23, 0.0  ;;  %v1331_v38 = vmul.f32 0.2, %v1315_v23 }
 0x684   :  { %v1343_v37 = vsel %vm361_vm5, %v1335_v9, -1e+30  ;;  %v1342_v55 = vsel %vm360_vm7, %v1334_v34, -1e+30  ;;  %v1337_v52 = vsel %vm1321_vm4, %v1313_v3, %v1329_v17  ;;  %v1336_v63 = vsel %vm1320_vm0, %v1312_v2, %v1328_v7 }
 0x685   :  { %v1353_v45 = vsel %vm376_vm6, %v1343_v37, -inf  ;;  %v1350_v54 = vsel %vm376_vm6, %v1342_v55, -inf  ;;  %v1345_v26 = vsel %vm363_vm8, %v1337_v52, -1e+30  ;;  %v1344_v4 = vsel %vm362_vm9, %v1336_v63, -1e+30 }
 0x686   :  { %1354 = vmax.xlane.f32.xlu0 %v1353_v45  ;;  %1351 = vmax.xlane.f32.xlu1 %v1350_v54  ;;  %vm1322_vm12 = vcmp.gt.f32.partialorder %v1314_v25, 0.0  ;;  %v1339_v11 = vsel %vm1323_vm11, %v1315_v23, %v1331_v38  ;;  %v1330_v15 = vmul.f32 0.2, %v1314_v25  ;;  %vm1325_vm5 = vcmp.gt.f32.partialorder %v1317_v29, 0.0 }
 0x687   :  { %v1333_v12 = vmul.f32 0.2, %v1317_v29  ;;  %vm1324_vm7 = vcmp.gt.f32.partialorder %v1316_v32, 0.0  ;;  %v1332_v5 = vmul.f32 0.2, %v1316_v32  ;;  %v1359_v10 = vsel %vm376_vm6, %v1345_v26, -inf }
 0x688   :  { %v1356_v16 = vsel %vm376_vm6, %v1344_v4, -inf  ;;  %v1338_v22 = vsel %vm1322_vm12, %v1314_v25, %v1330_v15  ;;  %v1347_v24 = vsel %vm365_vm15, %v1339_v11, -1e+30  ;;  %vm2953_vm8 = vcmp.gt.f32.partialorder %v2520_v1, 0.0 }
 0x689   :  { %v1346_v27 = vsel %vm364_vm10, %v1338_v22, -1e+30  ;;  %v1341_v42 = vsel %vm1325_vm5, %v1317_v29, %v1333_v12  ;;  %v1340_v61 = vsel %vm1324_vm7, %v1316_v32, %v1332_v5  ;;  %v1365_v31 = vsel %vm376_vm6, %v1347_v24, -inf }
 0x68a   :  { %1360 = vmax.xlane.f32.xlu0 %v1359_v10  ;;  %1357 = vmax.xlane.f32.xlu1 %v1356_v16  ;;  %v1362_v8 = vsel %vm376_vm6, %v1346_v27, -inf  ;;  %v1349_v28 = vsel %vm2953_vm8, %v1341_v42, -1e+30  ;;  %vm2954_vm9 = vcmp.gt.f32.partialorder %v2529_v6, 0.0 }
 0x68b   :  { %v1348_v40 = vsel %vm2954_vm9, %v1340_v61, -1e+30  ;;  %v1371_v48 = vsel %vm376_vm6, %v1349_v28, -inf }
 0x68c   :  { %v1368_v13 = vsel %vm376_vm6, %v1348_v40, -inf }
 0x68e   :  { %1366 = vmax.xlane.f32.xlu0 %v1365_v31  ;;  %1363 = vmax.xlane.f32.xlu1 %v1362_v8 }
 0x692   :  { %1372 = vmax.xlane.f32.xlu0 %v1371_v48  ;;  %1369 = vmax.xlane.f32.xlu1 %v1368_v13 }
 0x713   :  { %v1355_v58 = vpop.xlane.xlu0 %1354  ;;  %v1352_v18 = vpop.xlane.xlu1 %1351 }
 0x714   :  { %v1375_v21 = vsub.f32 %v1343_v37, %v1355_v58  ;;  %v1374_v49 = vsub.f32 %v1342_v55, %v1352_v18  ;;  %v1743_v58 = vld [vmem:[%s2947_s9] ss:$0 sm:$0xff] }
 0x716   :  { %v1384_v56 = vmul.f32 1.442695, %v1375_v21  ;;  %v1382_v50 = vmul.f32 1.442695, %v1374_v49 }
 0x717   :  { %v1361_v62 = vpop.xlane.xlu0 %1360  ;;  %v1358_v35 = vpop.xlane.xlu1 %1357 }
 0x718   :  { %2195 = vpow2.f32 %v1384_v56  ;;  %v1377_v1 = vsub.f32 %v1345_v26, %v1361_v62  ;;  %v1376_v30 = vsub.f32 %v1344_v4, %v1358_v35 }
 0x719   :  { %2197 = vpow2.f32 %v1382_v50 }
 0x71a   :  { %v1388_v6 = vmul.f32 1.442695, %v1377_v1  ;;  %v1386_v44 = vmul.f32 1.442695, %v1376_v30 }
 0x71b   :  { %v1367_v14 = vpop.xlane.xlu0 %1366  ;;  %v1364_v43 = vpop.xlane.xlu1 %1363 }
 0x71c   :  { %2199 = vpow2.f32 %v1388_v6  ;;  %v1379_v19 = vsub.f32 %v1347_v24, %v1367_v14  ;;  %v1378_v46 = vsub.f32 %v1346_v27, %v1364_v43 }
 0x71d   :  { %2201 = vpow2.f32 %v1386_v44 }
 0x71e   :  { %v1392_v51 = vmul.f32 1.442695, %v1379_v19  ;;  %v1390_v53 = vmul.f32 1.442695, %v1378_v46 }
 0x71f   :  { %v1373_v39 = vpop.xlane.xlu0 %1372  ;;  %v1370_v41 = vpop.xlane.xlu1 %1369 }
 0x720   :  { %2203 = vpow2.f32 %v1392_v51  ;;  %v1381_v20 = vsub.f32 %v1349_v28, %v1373_v39  ;;  %v1380_v57 = vsub.f32 %v1348_v40, %v1370_v41 }
 0x721   :  { %2205 = vpow2.f32 %v1390_v53 }
 0x722   :  { %v2196_v59 = vpop.eup %2195  ;;  %v1396_v60 = vmul.f32 1.442695, %v1381_v20  ;;  %v1394_v0 = vmul.f32 1.442695, %v1380_v57 }
 0x723   :  { %v2198_v47 = vpop.eup %2197  ;;  %v1401_v3 = vsel %vm376_vm6, %v2196_v59, 0.0 }
 0x724   :  { %2207 = vpow2.f32 %v1396_v60  ;;  %1402 = vadd.xlane.f32.xlu0 %v1401_v3  ;;  %v1398_v2 = vsel %vm376_vm6, %v2198_v47, 0.0 }
 0x725   :  { %2209 = vpow2.f32 %v1394_v0  ;;  %1399 = vadd.xlane.f32.xlu1 %v1398_v2 }
 0x726   :  { %v2200_v23 = vpop.eup %2199 }
 0x727   :  { %v2202_v25 = vpop.eup %2201  ;;  %v1407_v29 = vsel %vm376_vm6, %v2200_v23, 0.0 }
 0x728   :  { %1408 = vadd.xlane.f32.xlu0 %v1407_v29  ;;  %v1404_v32 = vsel %vm376_vm6, %v2202_v25, 0.0 }
 0x729   :  { %1405 = vadd.xlane.f32.xlu1 %v1404_v32 }
 0x72a   :  { %v2204_v36 = vpop.eup %2203 }
 0x72b   :  { %v2206_v33 = vpop.eup %2205  ;;  %v1413_v17 = vsel %vm376_vm6, %v2204_v36, 0.0 }
 0x72c   :  { %1414 = vadd.xlane.f32.xlu0 %v1413_v17  ;;  %v1410_v7 = vsel %vm376_vm6, %v2206_v33, 0.0 }
 0x72d   :  { %1411 = vadd.xlane.f32.xlu1 %v1410_v7 }
 0x72e   :  { %v2208_v9 = vpop.eup %2207 }
 0x72f   :  { %v2210_v34 = vpop.eup %2209  ;;  %v1419_v38 = vsel %vm376_vm6, %v2208_v9, 0.0 }
 0x730   :  { %1420 = vadd.xlane.f32.xlu0 %v1419_v38  ;;  %v1416_v37 = vsel %vm376_vm6, %v2210_v34, 0.0 }
 0x731   :  { %1417 = vadd.xlane.f32.xlu1 %v1416_v37 }
 0x7b1   :  { %v1403_v55 = vpop.xlane.xlu0 %1402 }
 0x7b2   :  { %2211 = vrcp.f32 %v1403_v55  ;;  %v1400_v52 = vpop.xlane.xlu1 %1399 }
 0x7b3   :  { %2213 = vrcp.f32 %v1400_v52 }
 0x7b5   :  { %v1409_v63 = vpop.xlane.xlu0 %1408 }
 0x7b6   :  { %2215 = vrcp.f32 %v1409_v63  ;;  %v1406_v45 = vpop.xlane.xlu1 %1405 }
 0x7b7   :  { %2217 = vrcp.f32 %v1406_v45 }
 0x7b9   :  { %v1415_v54 = vpop.xlane.xlu0 %1414 }
 0x7ba   :  { %2219 = vrcp.f32 %v1415_v54  ;;  %v1412_v26 = vpop.xlane.xlu1 %1411 }
 0x7bb   :  { %2221 = vrcp.f32 %v1412_v26 }
 0x7bc   :  { %v2212_v4 = vpop.eup %2211 }
 0x7bd   :  { %v2214_v11 = vpop.eup %2213  ;;  %v1431_v15 = vmul.f32 %v2212_v4, %v2196_v59  ;;  %v1421_v12 = vpop.xlane.xlu0 %1420 }
 0x7be   :  { %2223 = vrcp.f32 %v1421_v12  ;;  %v1418_v5 = vpop.xlane.xlu1 %1417  ;;  %v1430_v10 = vmul.f32 %v2214_v11, %v2198_v47 }
 0x7bf   :  { %2225 = vrcp.f32 %v1418_v5 }
 0x7c0   :  { %v2216_v16 = vpop.eup %2215  ;;  %1986 = vmatprep.mubr.msk.f32.mxu0 %vm376_vm6, %v1430_v10 }
 0x7c1   :  { %v2218_v22 = vpop.eup %2217  ;;  %1987 = vmatmul.mubr.msk.f32.vlgmr.msra.gmra.mrb[24].mxu0 %vm376_vm6, %v1431_v15  ;;  %v1433_v24 = vmul.f32 %v2216_v16, %v2200_v23 }
 0x7c2   :  { %v1432_v27 = vmul.f32 %v2218_v22, %v2202_v25 }
 0x7c4   :  { %v2220_v42 = vpop.eup %2219  ;;  %1989 = vmatprep.mubr.msk.f32.mxu0 %vm376_vm6, %v1432_v27 }
 0x7c5   :  { %v2222_v61 = vpop.eup %2221  ;;  %1990 = vmatmul.mubr.msk.f32.gmra.mrb[26].mxu0 %vm376_vm6, %v1433_v24  ;;  %v1435_v31 = vmul.f32 %v2220_v42, %v2204_v36 }
 0x7c6   :  { %v1434_v8 = vmul.f32 %v2222_v61, %v2206_v33 }
 0x7c8   :  { %v2224_v28 = vpop.eup %2223  ;;  %1992 = vmatprep.mubr.msk.f32.mxu0 %vm376_vm6, %v1434_v8 }
 0x7c9   :  { %v2226_v40 = vpop.eup %2225  ;;  %1993 = vmatmul.mubr.msk.f32.gmra.mrb[28].mxu0 %vm376_vm6, %v1435_v31  ;;  %v1437_v48 = vmul.f32 %v2224_v28, %v2208_v9 }
 0x7ca   :  { %v1436_v13 = vmul.f32 %v2226_v40, %v2210_v34 }
 0x7cc   :  { %1995 = vmatprep.mubr.msk.f32.mxu0 %vm376_vm6, %v1436_v13 }
 0x7cd   :  { %1996 = vmatmul.mubr.msk.f32.gmra.mrb[30].mxu0 %vm376_vm6, %v1437_v48 }
 0x894   :  { %v1988_v18 = vpop.f32.mrb[24].mxu0 }
 0x895   :  { %v1541_v21 = vadd.f32 %v1988_v18, %v1743_v58  ;;  %v1535_v49 = vpop.f32.mrb[25].mxu0 }
 0x896   :  { %v1536_v56 = vadd.f32 %v1743_v58, %v1535_v49 }
 0x897   :  { %v1577_v50 = vsel %vm186_vm2, %v1541_v21, -inf }
 0x898   :  { %1578 = vmax.xlane.f32.xlu0 %v1577_v50  ;;  %v1991_v62 = vpop.f32.mrb[26].mxu0  ;;  %v1574_v35 = vsel %vm186_vm2, %v1536_v56, -inf }
 0x899   :  { %v1551_v1 = vadd.f32 %v1991_v62, %v1743_v58  ;;  %1575 = vmax.xlane.f32.xlu1 %v1574_v35  ;;  %v1545_v30 = vpop.f32.mrb[27].mxu0 }
 0x89a   :  { %v1546_v6 = vadd.f32 %v1743_v58, %v1545_v30 }
 0x89b   :  { %v1583_v44 = vsel %vm186_vm2, %v1551_v1, -inf }
 0x89c   :  { %1584 = vmax.xlane.f32.xlu0 %v1583_v44  ;;  %v1994_v14 = vpop.f32.mrb[28].mxu0  ;;  %v1580_v43 = vsel %vm186_vm2, %v1546_v6, -inf }
 0x89d   :  { %v1561_v19 = vadd.f32 %v1994_v14, %v1743_v58  ;;  %1581 = vmax.xlane.f32.xlu1 %v1580_v43  ;;  %v1555_v46 = vpop.f32.mrb[29].mxu0 }
 0x89e   :  { %v1556_v51 = vadd.f32 %v1743_v58, %v1555_v46 }
 0x89f   :  { %v1589_v53 = vsel %vm186_vm2, %v1561_v19, -inf }
 0x8a0   :  { %1590 = vmax.xlane.f32.xlu0 %v1589_v53  ;;  %v1997_v39 = vpop.f32.mrb[30].mxu0  ;;  %v1586_v41 = vsel %vm186_vm2, %v1556_v51, -inf }
 0x8a1   :  { %v1571_v20 = vadd.f32 %v1997_v39, %v1743_v58  ;;  %1587 = vmax.xlane.f32.xlu1 %v1586_v41  ;;  %v1565_v57 = vpop.f32.mrb[31].mxu0 }
 0x8a2   :  { %v1566_v59 = vadd.f32 %v1743_v58, %v1565_v57 }
 0x8a3   :  { %v1595_v60 = vsel %vm186_vm2, %v1571_v20, -inf }
 0x8a4   :  { %1596 = vmax.xlane.f32.xlu0 %v1595_v60  ;;  %v1592_v0 = vsel %vm186_vm2, %v1566_v59, -inf }
 0x8a5   :  { %1593 = vmax.xlane.f32.xlu1 %v1592_v0 }
 0x925   :  { %v1579_v47 = vpop.xlane.xlu0 %1578 }
 0x926   :  { %v2866_v3 = vsub.f32 %v1541_v21, %v1579_v47  ;;  %v1576_v2 = vpop.xlane.xlu1 %1575 }
 0x927   :  { %v2868_v23 = vsub.f32 %v1536_v56, %v1576_v2 }
 0x928   :  { %v1608_v25 = vmul.f32 1.442695, %v2866_v3 }
 0x929   :  { %v1606_v29 = vmul.f32 1.442695, %v2868_v23  ;;  %v1585_v32 = vpop.xlane.xlu0 %1584 }
 0x92a   :  { %2227 = vpow2.f32 %v1608_v25  ;;  %v2872_v36 = vsub.f32 %v1551_v1, %v1585_v32  ;;  %v1582_v33 = vpop.xlane.xlu1 %1581 }
 0x92b   :  { %2229 = vpow2.f32 %v1606_v29  ;;  %v2874_v17 = vsub.f32 %v1546_v6, %v1582_v33 }
 0x92c   :  { %v1612_v7 = vmul.f32 1.442695, %v2872_v36 }
 0x92d   :  { %v1610_v9 = vmul.f32 1.442695, %v2874_v17  ;;  %v1591_v34 = vpop.xlane.xlu0 %1590 }
 0x92e   :  { %2231 = vpow2.f32 %v1612_v7  ;;  %v2878_v38 = vsub.f32 %v1561_v19, %v1591_v34  ;;  %v1588_v37 = vpop.xlane.xlu1 %1587 }
 0x92f   :  { %2233 = vpow2.f32 %v1610_v9  ;;  %v2880_v55 = vsub.f32 %v1556_v51, %v1588_v37 }
 0x930   :  { %v1616_v52 = vmul.f32 1.442695, %v2878_v38 }
 0x931   :  { %v1614_v63 = vmul.f32 1.442695, %v2880_v55  ;;  %v1597_v45 = vpop.xlane.xlu0 %1596 }
 0x932   :  { %2235 = vpow2.f32 %v1616_v52  ;;  %v2884_v54 = vsub.f32 %v1571_v20, %v1597_v45  ;;  %v1594_v26 = vpop.xlane.xlu1 %1593 }
 0x933   :  { %2237 = vpow2.f32 %v1614_v63  ;;  %v2886_v4 = vsub.f32 %v1566_v59, %v1594_v26 }
 0x934   :  { %v2228_v11 = vpop.eup %2227  ;;  %v1620_v15 = vmul.f32 1.442695, %v2884_v54 }
 0x935   :  { %v2230_v12 = vpop.eup %2229  ;;  %v1618_v5 = vmul.f32 1.442695, %v2886_v4  ;;  %v1625_v10 = vsel %vm186_vm2, %v2228_v11, 0.0 }
 0x936   :  { %2239 = vpow2.f32 %v1620_v15  ;;  %1626 = vadd.xlane.f32.xlu0 %v1625_v10  ;;  %v1622_v16 = vsel %vm186_vm2, %v2230_v12, 0.0 }
 0x937   :  { %2241 = vpow2.f32 %v1618_v5  ;;  %1623 = vadd.xlane.f32.xlu1 %v1622_v16 }
 0x938   :  { %v2232_v22 = vpop.eup %2231 }
 0x939   :  { %v2234_v24 = vpop.eup %2233  ;;  %v1631_v27 = vsel %vm186_vm2, %v2232_v22, 0.0 }
 0x93a   :  { %1632 = vadd.xlane.f32.xlu0 %v1631_v27  ;;  %v1628_v42 = vsel %vm186_vm2, %v2234_v24, 0.0 }
 0x93b   :  { %1629 = vadd.xlane.f32.xlu1 %v1628_v42 }
 0x93c   :  { %v2236_v61 = vpop.eup %2235 }
 0x93d   :  { %v2238_v31 = vpop.eup %2237  ;;  %v1637_v8 = vsel %vm186_vm2, %v2236_v61, 0.0 }
 0x93e   :  { %1638 = vadd.xlane.f32.xlu0 %v1637_v8  ;;  %v1634_v28 = vsel %vm186_vm2, %v2238_v31, 0.0 }
 0x93f   :  { %1635 = vadd.xlane.f32.xlu1 %v1634_v28 }
 0x940   :  { %v2240_v40 = vpop.eup %2239 }
 0x941   :  { %v2242_v48 = vpop.eup %2241  ;;  %v1643_v13 = vsel %vm186_vm2, %v2240_v40, 0.0 }
 0x942   :  { %1644 = vadd.xlane.f32.xlu0 %v1643_v13  ;;  %v1640_v58 = vsel %vm186_vm2, %v2242_v48, 0.0 }
 0x943   :  { %1641 = vadd.xlane.f32.xlu1 %v1640_v58 }
 0x9c3   :  { %v1627_v18 = vpop.xlane.xlu0 %1626 }
 0x9c4   :  { %2243 = vlog2.f32 %v1627_v18  ;;  %v1624_v21 = vpop.xlane.xlu1 %1623 }
 0x9c5   :  { %2245 = vlog2.f32 %v1624_v21 }
 0x9c7   :  { %v1633_v49 = vpop.xlane.xlu0 %1632 }
 0x9c8   :  { %2247 = vlog2.f32 %v1633_v49  ;;  %v1630_v56 = vpop.xlane.xlu1 %1629 }
 0x9c9   :  { %2249 = vlog2.f32 %v1630_v56 }
 0x9cb   :  { %v1639_v50 = vpop.xlane.xlu0 %1638 }
 0x9cc   :  { %2251 = vlog2.f32 %v1639_v50  ;;  %v1636_v62 = vpop.xlane.xlu1 %1635 }
 0x9cd   :  { %2253 = vlog2.f32 %v1636_v62 }
 0x9ce   :  { %v2244_v35 = vpop.eup %2243 }
 0x9cf   :  { %v2246_v1 = vpop.eup %2245  ;;  %v1649_v30 = vmul.f32 0.6931472, %v2244_v35  ;;  %v1645_v6 = vpop.xlane.xlu0 %1644 }
 0x9d0   :  { %v1647_v44 = vmul.f32 0.6931472, %v2246_v1  ;;  %2255 = vlog2.f32 %v1645_v6  ;;  %v1642_v14 = vpop.xlane.xlu1 %1641 }
 0x9d1   :  { %v1663_v43 = vsub.f32 %v2866_v3, %v1649_v30  ;;  %2257 = vlog2.f32 %v1642_v14 }
 0x9d2   :  { %v2248_v19 = vpop.eup %2247  ;;  %v1662_v46 = vsub.f32 %v2868_v23, %v1647_v44 }
 0x9d3   :  { %v2250_v51 = vpop.eup %2249  ;;  %1671 = vst.msk [vmem:[%s2948_s10 + $0x8] sm:$0xff] %vm186_vm2, %v1663_v43  ;;  %v1653_v53 = vmul.f32 0.6931472, %v2248_v19 }
 0x9d4   :  { %1670 = vst.msk [vmem:[%s2948_s10] sm:$0xff] %vm186_vm2, %v1662_v46  ;;  %v1651_v39 = vmul.f32 0.6931472, %v2250_v51 }
 0x9d5   :  { %v1665_v41 = vsub.f32 %v2872_v36, %v1653_v53 }
 0x9d6   :  { %v2252_v20 = vpop.eup %2251  ;;  %v1664_v57 = vsub.f32 %v2874_v17, %v1651_v39 }
 0x9d7   :  { %v2254_v59 = vpop.eup %2253  ;;  %1673 = vst.msk [vmem:[%s2948_s10 + $0x18] sm:$0xff] %vm186_vm2, %v1665_v41  ;;  %v1657_v60 = vmul.f32 0.6931472, %v2252_v20 }
 0x9d8   :  { %1672 = vst.msk [vmem:[%s2948_s10 + $0x10] sm:$0xff] %vm186_vm2, %v1664_v57  ;;  %v1655_v0 = vmul.f32 0.6931472, %v2254_v59 }
 0x9d9   :  { %v1667_v47 = vsub.f32 %v2878_v38, %v1657_v60 }
 0x9da   :  { %v2256_v3 = vpop.eup %2255  ;;  %v1666_v2 = vsub.f32 %v2880_v55, %v1655_v0 }
 0x9db   :  { %v2258_v23 = vpop.eup %2257  ;;  %1675 = vst.msk [vmem:[%s2948_s10 + $0x28] sm:$0xff] %vm186_vm2, %v1667_v47  ;;  %v1661_v25 = vmul.f32 0.6931472, %v2256_v3 }
 0x9dc   :  { %1674 = vst.msk [vmem:[%s2948_s10 + $0x20] sm:$0xff] %vm186_vm2, %v1666_v2  ;;  %v1659_v29 = vmul.f32 0.6931472, %v2258_v23 }
 0x9dd   :  { %v1669_v32 = vsub.f32 %v2884_v54, %v1661_v25 }
 0x9de   :  { %v1668_v36 = vsub.f32 %v2886_v4, %v1659_v29 }
 0x9df   :  { %1677 = vst.msk [vmem:[%s2948_s10 + $0x38] sm:$0xff] %vm186_vm2, %v1669_v32 }
 0x9e0   :  { %1676 = vst.msk [vmem:[%s2948_s10 + $0x30] sm:$0xff] %vm186_vm2, %v1668_v36 }

</bundles_post_ra>
